<compile_context>
chip_gen: v5e
topology: v5e:2x2
jax: 0.10.0
libtpu: 0.0.40
codegen_flags: <defaults>
</compile_context>

<pallas_src>
import functools

import numpy as np
import jax
import jax.numpy as jnp
from jax import lax
from jax.experimental import pallas as pl
from jax.experimental.pallas import tpu as pltpu

BN_EPS = 1e-5


# ----------------------------------------------------------------------------
# helpers
# ----------------------------------------------------------------------------
def _round_up(x, m):
    return (x + m - 1) // m * m


def _tile(dim, pref, align):
    """Pick (tile, padded_dim) so padded_dim % tile == 0 and tile is aligned."""
    if dim <= pref:
        t = _round_up(dim, align)
        return t, t
    return pref, _round_up(dim, pref)


def fold_bn(gamma, beta, mean, var, eps=BN_EPS):
    """Eval-mode BatchNorm folded into y = x * scale + bias."""
    scale = gamma / jnp.sqrt(var + eps)
    bias = beta - mean * scale
    return scale.astype(jnp.float32), bias.astype(jnp.float32)


# ----------------------------------------------------------------------------
# Pallas kernel 1: tiled matmul with fused BN affine (+ optional residual, ReLU)
#   out = act(A @ B * scale + bias [+ residual])
#   A, B (and residual) are bf16; accumulation and epilogue math are f32.
# ----------------------------------------------------------------------------
def _mm_bn_kernel(a_ref, b_ref, s_ref, c_ref, o_ref, acc_ref, *, relu):
    @pl.when(pl.program_id(2) == 0)
    def _():
        acc_ref[...] = jnp.zeros_like(acc_ref)

    acc_ref[...] += jnp.dot(a_ref[...], b_ref[...],
                            preferred_element_type=jnp.float32)

    @pl.when(pl.program_id(2) == pl.num_programs(2) - 1)
    def _():
        r = acc_ref[...] * s_ref[...] + c_ref[...]
        if relu:
            r = jnp.maximum(r, 0.0)
        o_ref[...] = r.astype(o_ref.dtype)


def _mm_bn_res_kernel(a_ref, b_ref, s_ref, c_ref, r_ref, o_ref, acc_ref, *, relu):
    @pl.when(pl.program_id(2) == 0)
    def _():
        acc_ref[...] = jnp.zeros_like(acc_ref)

    acc_ref[...] += jnp.dot(a_ref[...], b_ref[...],
                            preferred_element_type=jnp.float32)

    @pl.when(pl.program_id(2) == pl.num_programs(2) - 1)
    def _():
        r = acc_ref[...] * s_ref[...] + c_ref[...] + r_ref[...].astype(jnp.float32)
        if relu:
            r = jnp.maximum(r, 0.0)
        o_ref[...] = r.astype(o_ref.dtype)


def matmul_bn(a, b, scale, bias, residual=None, relu=False,
              out_dtype=jnp.bfloat16):
    """a: (M, K), b: (K, N) -> act((a @ b) * scale + bias [+ residual])."""
    M, K = a.shape
    K2, N = b.shape
    assert K == K2
    a = a.astype(jnp.bfloat16)
    b = b.astype(jnp.bfloat16)
    scale = scale.astype(jnp.float32).reshape(1, N)
    bias = bias.astype(jnp.float32).reshape(1, N)

    tm, Mp = _tile(M, 256, 32)     # sublane-friendly for bf16/f32
    tn, Np = _tile(N, 256, 128)    # lane-aligned
    tk, Kp = _tile(K, 1024, 128)   # large K tiles for bf16 MXU

    if (Mp, Kp) != (M, K):
        a = jnp.pad(a, ((0, Mp - M), (0, Kp - K)))
    if (Kp, Np) != (K, N):
        b = jnp.pad(b, ((0, Kp - K), (0, Np - N)))
    if Np != N:
        scale = jnp.pad(scale, ((0, 0), (0, Np - N)))
        bias = jnp.pad(bias, ((0, 0), (0, Np - N)))

    in_specs = [
        pl.BlockSpec((tm, tk), lambda i, j, k: (i, k)),
        pl.BlockSpec((tk, tn), lambda i, j, k: (k, j)),
        pl.BlockSpec((1, tn), lambda i, j, k: (0, j)),
        pl.BlockSpec((1, tn), lambda i, j, k: (0, j)),
    ]
    args = [a, b, scale, bias]
    if residual is not None:
        r = residual.astype(jnp.bfloat16)
        if (Mp, Np) != (M, N):
            r = jnp.pad(r, ((0, Mp - M), (0, Np - N)))
        # residual block index does not depend on k -> fetched once per (i, j)
        in_specs.append(pl.BlockSpec((tm, tn), lambda i, j, k: (i, j)))
        args.append(r)
        kern = functools.partial(_mm_bn_res_kernel, relu=relu)
    else:
        kern = functools.partial(_mm_bn_kernel, relu=relu)

    out = pl.pallas_call(
        kern,
        out_shape=jax.ShapeDtypeStruct((Mp, Np), out_dtype),
        grid=(Mp // tm, Np // tn, Kp // tk),
        in_specs=in_specs,
        out_specs=pl.BlockSpec((tm, tn), lambda i, j, k: (i, j)),
        scratch_shapes=[pltpu.VMEM((tm, tn), jnp.float32)],
        compiler_params=pltpu.CompilerParams(
            dimension_semantics=("parallel", "parallel", "arbitrary")),
    )(*args)
    if (Mp, Np) != (M, N):
        out = out[:M, :N]
    return out


def conv1x1_bn(x, w, scale, bias, stride=1, relu=False, residual=None,
               out_dtype=jnp.bfloat16):
    """x: (B, H, W, Cin) NHWC; w: PyTorch (Cout, Cin, 1, 1)."""
    if stride != 1:
        x = x[:, ::stride, ::stride, :]
    B, H, W, Cin = x.shape
    Cout = w.shape[0]
    a = x.reshape(B * H * W, Cin)
    wmat = jnp.transpose(w.reshape(Cout, Cin), (1, 0))          # (Cin, Cout)
    res2 = None if residual is None else residual.reshape(B * H * W, Cout)
    out = matmul_bn(a, wmat, scale, bias, residual=res2, relu=relu,
                    out_dtype=out_dtype)
    return out.reshape(B, H, W, Cout)


# ----------------------------------------------------------------------------
# Pallas kernel 2: fused 3x3 stride-2 pad-1 conv + BN + ReLU.
#   The padded input is parity-decomposed (space-to-depth) in JAX so every tap is
#   a *contiguous* slice; the kernel reads the per-batch image once and
#   accumulates all 9 taps with in-VMEM bf16 matmuls (no im2col in HBM).
# ----------------------------------------------------------------------------
def _conv3x3_kernel(xp_ref, w_ref, s_ref, c_ref, o_ref):
    # xp_ref: (1, 4, Ho+1, Wo+1, Cin)  parity grids of the padded input
    # w_ref : (9, Cin, Cout)           per-tap weight matrices
    # o_ref : (1, Ho*Wo, Cout)
    _, _, Ho1, Wo1, Cin = xp_ref.shape
    Ho, Wo = Ho1 - 1, Wo1 - 1
    Cout = o_ref.shape[-1]

    acc = jnp.zeros((Ho * Wo, Cout), jnp.float32)
    for i in range(3):                      # unrolled tap loop (static)
        pi, di = i % 2, i // 2
        for j in range(3):
            pj, dj = j % 2, j // 2
            tap = xp_ref[0, pi * 2 + pj, di:di + Ho, dj:dj + Wo, :]
            acc = acc + jnp.dot(tap.reshape(Ho * Wo, Cin), w_ref[i * 3 + j],
                                preferred_element_type=jnp.float32)
    r = acc * s_ref[...] + c_ref[...]
    r = jnp.maximum(r, 0.0)
    o_ref[0] = r.astype(o_ref.dtype)


def conv3x3_s2_bn_relu(x, w, scale, bias, out_dtype=jnp.bfloat16):
    """x: (B, H, W, Cin) NHWC; w: PyTorch (Cout, Cin, 3, 3); stride=2, pad=1."""
    B, H, W, Cin = x.shape
    Cout = w.shape[0]
    assert H % 2 == 0 and W % 2 == 0
    Ho, Wo = H // 2, W // 2

    x = x.astype(jnp.bfloat16)
    xpad = jnp.pad(x, ((0, 0), (1, 1), (1, 1), (0, 0)))          # (B, H+2, W+2, Cin)
    # space-to-depth parity split: xp[b, pi*2+pj, r, c] = xpad[b, 2r+pi, 2c+pj]
    xp = xpad.reshape(B, Ho + 1, 2, Wo + 1, 2, Cin)
    xp = jnp.transpose(xp, (0, 2, 4, 1, 3, 5)).reshape(B, 4, Ho + 1, Wo + 1, Cin)

    wt = jnp.transpose(w, (2, 3, 1, 0)).reshape(9, Cin, Cout).astype(jnp.bfloat16)
    s = scale.astype(jnp.float32).reshape(1, Cout)
    c = bias.astype(jnp.float32).reshape(1, Cout)

    out = pl.pallas_call(
        _conv3x3_kernel,
        out_shape=jax.ShapeDtypeStruct((B, Ho * Wo, Cout), out_dtype),
        grid=(B,),
        in_specs=[
            pl.BlockSpec((1, 4, Ho + 1, Wo + 1, Cin),
                         lambda b: (b, 0, 0, 0, 0)),
            pl.BlockSpec((9, Cin, Cout), lambda b: (0, 0, 0)),
            pl.BlockSpec((1, Cout), lambda b: (0, 0)),
            pl.BlockSpec((1, Cout), lambda b: (0, 0)),
        ],
        out_specs=pl.BlockSpec((1, Ho * Wo, Cout), lambda b: (b, 0, 0)),
        compiler_params=pltpu.CompilerParams(
            dimension_semantics=("parallel",)),
    )(xp, wt, s, c)
    return out.reshape(B, Ho, Wo, Cout)


# ----------------------------------------------------------------------------
# EncoderBottleneck forward (NCHW in / NCHW out, matching the PyTorch module)
# ----------------------------------------------------------------------------
def encoder_bottleneck_forward(x_nchw, p, stride=2):
    x = jnp.transpose(x_nchw, (0, 2, 3, 1))          # NHWC (channels on lanes)
    xb = x.astype(jnp.bfloat16)                      # bf16 activations

    # downsample branch: 1x1 stride-s conv + BN (no ReLU)
    x_down = conv1x1_bn(xb, p["down_w"], p["down_s"], p["down_b"],
                        stride=stride, relu=False)

    # main branch: conv1(1x1)+BN+ReLU -> conv2(3x3,s2)+BN+ReLU -> conv3(1x1)+BN
    h = conv1x1_bn(xb, p["c1_w"], p["n1_s"], p["n1_b"], relu=True)
    h = conv3x3_s2_bn_relu(h, p["c2_w"], p["n2_s"], p["n2_b"])
    assert h.shape[:3] == x_down.shape[:3], (h.shape, x_down.shape)

    # conv3 + BN3 + residual add + ReLU, all fused in one matmul epilogue
    y = conv1x1_bn(h, p["c3_w"], p["n3_s"], p["n3_b"], relu=True,
                   residual=x_down, out_dtype=jnp.float32)
    return jnp.transpose(y, (0, 3, 1, 2))


# ----------------------------------------------------------------------------
# deterministic synthetic parameters (eval-mode BN folded to scale/bias)
# ----------------------------------------------------------------------------
def make_params(key, in_channels, out_channels, base_width=64):
    width = int(out_channels * (base_width / 64))
    ks = jax.random.split(key, 8)

    def conv_w(k, cout, cin, kh, kw):
        fan = cin * kh * kw
        return jax.random.normal(k, (cout, cin, kh, kw), jnp.float32) / np.sqrt(fan)

    def bn_params(k, c):
        k1, k2, k3, k4 = jax.random.split(k, 4)
        gamma = 1.0 + 0.1 * jax.random.normal(k1, (c,), jnp.float32)
        beta = 0.1 * jax.random.normal(k2, (c,), jnp.float32)
        mean = 0.1 * jax.random.normal(k3, (c,), jnp.float32)
        var = 1.0 + 0.1 * jnp.abs(jax.random.normal(k4, (c,), jnp.float32))
        return fold_bn(gamma, beta, mean, var)

    p = {}
    p["down_w"] = conv_w(ks[0], out_channels, in_channels, 1, 1)
    p["down_s"], p["down_b"] = bn_params(ks[1], out_channels)
    p["c1_w"] = conv_w(ks[2], width, in_channels, 1, 1)
    p["n1_s"], p["n1_b"] = bn_params(ks[3], width)
    p["c2_w"] = conv_w(ks[4], width, width, 3, 3)
    p["n2_s"], p["n2_b"] = bn_params(ks[5], width)
    p["c3_w"] = conv_w(ks[6], out_channels, width, 1, 1)
    p["n3_s"], p["n3_b"] = bn_params(ks[7], out_channels)
    return p


# ----------------------------------------------------------------------------
# pure-JAX f32 reference (same math as the PyTorch module in eval mode)
# ----------------------------------------------------------------------------
def reference_forward(x_nchw, p, stride=2):
    x = jnp.transpose(x_nchw, (0, 2, 3, 1)).astype(jnp.float32)

    def conv(x, w, s, pad):
        return lax.conv_general_dilated(
            x, jnp.transpose(w, (2, 3, 1, 0)),
            window_strides=(s, s), padding=[(pad, pad), (pad, pad)],
            dimension_numbers=("NHWC", "HWIO", "NHWC"))

    x_down = conv(x, p["down_w"], stride, 0) * p["down_s"] + p["down_b"]
    h = jax.nn.relu(conv(x, p["c1_w"], 1, 0) * p["n1_s"] + p["n1_b"])
    h = jax.nn.relu(conv(h, p["c2_w"], 2, 1) * p["n2_s"] + p["n2_b"])
    h = conv(h, p["c3_w"], 1, 0) * p["n3_s"] + p["n3_b"]
    y = jax.nn.relu(h + x_down)
    return jnp.transpose(y, (0, 3, 1, 2))


# ----------------------------------------------------------------------------
if __name__ == "__main__":
    B, CIN, H, W = 2, 32, 16, 16
    COUT, STRIDE = 64, 2          # module is used with stride=2 (residual shapes match)

    key = jax.random.PRNGKey(0)
    kx, kp = jax.random.split(key)
    x = jax.random.normal(kx, (B, CIN, H, W), jnp.float32)
    params = make_params(kp, CIN, COUT)

    fwd = jax.jit(functools.partial(encoder_bottleneck_forward, stride=STRIDE))
    out = jax.block_until_ready(fwd(x, params))

    assert out.shape == (B, COUT, H // STRIDE, W // STRIDE), out.shape
    assert bool(jnp.all(jnp.isfinite(out)))

    ref = jax.block_until_ready(
        jax.jit(functools.partial(reference_forward, stride=STRIDE))(x, params))
    err = float(jnp.max(jnp.abs(out - ref)))
    tol = 0.05 * max(1.0, float(jnp.max(jnp.abs(ref))))   # generous bf16 tolerance
    assert err < tol, (err, tol)

    print("KERNEL_OK")
</pallas_src>

<mosaic_0001>
module attributes {stable_mosaic.version = 11 : i64} {
  func.func @_mm_bn_kernel(%arg0: i32, %arg1: i32, %arg2: i32, %arg3: memref<256x128xbf16, #tpu.memory_space<vmem>>, %arg4: memref<128x128xbf16, #tpu.memory_space<vmem>>, %arg5: memref<1x128xf32, #tpu.memory_space<vmem>>, %arg6: memref<1x128xf32, #tpu.memory_space<vmem>>, %arg7: memref<256x128xbf16, #tpu.memory_space<vmem>>, %arg8: memref<256x128xf32, #tpu.memory_space<vmem>>) attributes {dimension_semantics = [#tpu.dimension_semantics<parallel>, #tpu.dimension_semantics<parallel>, #tpu.dimension_semantics<arbitrary>], iteration_bounds = array<i64: 2, 1, 1>, scalar_prefetch = 0 : i64, scratch_operands = 1 : i64, tpu.core_type = #tpu.core_type<tc>, window_params = [{transform_indices = @transform_0, window_bounds = array<i64: 256, 128>}, {transform_indices = @transform_1, window_bounds = array<i64: 128, 128>}, {transform_indices = @transform_2, window_bounds = array<i64: 1, 128>}, {transform_indices = @transform_3, window_bounds = array<i64: 1, 128>}, {transform_indices = @transform_4, window_bounds = array<i64: 256, 128>}]} {
    %c0_i32 = arith.constant 0 : i32
    %0 = arith.cmpi eq, %arg2, %c0_i32 : i32
    %1 = arith.extui %0 : i1 to i32
    %c0_i32_0 = arith.constant 0 : i32
    %2 = arith.cmpi ne, %1, %c0_i32_0 : i32
    scf.if %2 {
      %cst_10 = arith.constant 0.000000e+00 : f32
      %12 = vector.broadcast %cst_10 : f32 to vector<256x128xf32>
      %c0_11 = arith.constant 0 : index
      %c0_12 = arith.constant 0 : index
      %13 = vector.load %arg8[%c0_11, %c0_12] : memref<256x128xf32, #tpu.memory_space<vmem>>, vector<256x128xf32>
      tpu.vector_store %arg8[%c0_11, %c0_12], %12 {strides = array<i32>} : memref<256x128xf32, #tpu.memory_space<vmem>>, vector<256x128xf32>,
    } else {
    }
    %c0 = arith.constant 0 : index
    %c0_1 = arith.constant 0 : index
    %3 = vector.load %arg8[%c0, %c0_1] : memref<256x128xf32, #tpu.memory_space<vmem>>, vector<256x128xf32>
    %c0_2 = arith.constant 0 : index
    %c0_3 = arith.constant 0 : index
    %4 = vector.load %arg3[%c0_2, %c0_3] : memref<256x128xbf16, #tpu.memory_space<vmem>>, vector<256x128xbf16>
    %c0_4 = arith.constant 0 : index
    %c0_5 = arith.constant 0 : index
    %5 = vector.load %arg4[%c0_4, %c0_5] : memref<128x128xbf16, #tpu.memory_space<vmem>>, vector<128x128xbf16>
    %cst = arith.constant dense<0.000000e+00> : vector<256x128xf32>
    %6 = tpu.matmul %4, %5, %cst {dimension_numbers = #tpu.dot_dimension_numbers<[1], [0], [0], [1], [0, 0, 1, 1], [], []>} : vector<256x128xbf16>, vector<128x128xbf16>, vector<256x128xf32> -> vector<256x128xf32>
    %7 = arith.addf %3, %6 : vector<256x128xf32>
    %c0_6 = arith.constant 0 : index
    %c0_7 = arith.constant 0 : index
    %8 = vector.load %arg8[%c0_6, %c0_7] : memref<256x128xf32, #tpu.memory_space<vmem>>, vector<256x128xf32>
    tpu.vector_store %arg8[%c0_6, %c0_7], %7 {strides = array<i32>} : memref<256x128xf32, #tpu.memory_space<vmem>>, vector<256x128xf32>,
    %c0_i32_8 = arith.constant 0 : i32
    %9 = arith.cmpi eq, %arg2, %c0_i32_8 : i32
    %10 = arith.extui %9 : i1 to i32
    %c0_i32_9 = arith.constant 0 : i32
    %11 = arith.cmpi ne, %10, %c0_i32_9 : i32
    scf.if %11 {
      %c0_10 = arith.constant 0 : index
      %c0_11 = arith.constant 0 : index
      %12 = vector.load %arg8[%c0_10, %c0_11] : memref<256x128xf32, #tpu.memory_space<vmem>>, vector<256x128xf32>
      %c0_12 = arith.constant 0 : index
      %c0_13 = arith.constant 0 : index
      %13 = vector.load %arg5[%c0_12, %c0_13] : memref<1x128xf32, #tpu.memory_space<vmem>>, vector<1x128xf32>
      %14 = vector.broadcast %13 : vector<1x128xf32> to vector<256x128xf32>
      %15 = arith.mulf %12, %14 : vector<256x128xf32>
      %c0_14 = arith.constant 0 : index
      %c0_15 = arith.constant 0 : index
      %16 = vector.load %arg6[%c0_14, %c0_15] : memref<1x128xf32, #tpu.memory_space<vmem>>, vector<1x128xf32>
      %17 = vector.broadcast %16 : vector<1x128xf32> to vector<256x128xf32>
      %18 = arith.addf %15, %17 : vector<256x128xf32>
      %cst_16 = arith.constant 0.000000e+00 : f32
      %19 = vector.broadcast %cst_16 : f32 to vector<256x128xf32>
      %20 = arith.maximumf %18, %19 : vector<256x128xf32>
      %21 = arith.truncf %20 : vector<256x128xf32> to vector<256x128xbf16>
      %c0_17 = arith.constant 0 : index
      %c0_18 = arith.constant 0 : index
      %22 = vector.load %arg7[%c0_17, %c0_18] : memref<256x128xbf16, #tpu.memory_space<vmem>>, vector<256x128xbf16>
      tpu.vector_store %arg7[%c0_17, %c0_18], %21 {strides = array<i32>} : memref<256x128xbf16, #tpu.memory_space<vmem>>, vector<256x128xbf16>,
    } else {
    }
    return
  }
  func.func @transform_0(%arg0: i32, %arg1: i32, %arg2: i32) -> (i32, i32) {
    %c0_i32 = arith.constant 0 : i32
    return %arg0, %arg2 : i32, i32
  }
  func.func @transform_1(%arg0: i32, %arg1: i32, %arg2: i32) -> (i32, i32) {
    %c0_i32 = arith.constant 0 : i32
    return %arg2, %arg1 : i32, i32
  }
  func.func @transform_2(%arg0: i32, %arg1: i32, %arg2: i32) -> (i32, i32) {
    %c0_i32 = arith.constant 0 : i32
    %c0_i32_0 = arith.constant 0 : i32
    return %c0_i32, %arg1 : i32, i32
  }
  func.func @transform_3(%arg0: i32, %arg1: i32, %arg2: i32) -> (i32, i32) {
    %c0_i32 = arith.constant 0 : i32
    %c0_i32_0 = arith.constant 0 : i32
    return %c0_i32, %arg1 : i32, i32
  }
  func.func @transform_4(%arg0: i32, %arg1: i32, %arg2: i32) -> (i32, i32) {
    %c0_i32 = arith.constant 0 : i32
    return %arg0, %arg1 : i32, i32
  }
}

module attributes {stable_mosaic.version = 11 : i64} {
  func.func @_conv3x3_kernel(%arg0: i32, %arg1: memref<1x4x9x9x64xbf16, #tpu.memory_space<vmem>>, %arg2: memref<9x64x64xbf16, #tpu.memory_space<vmem>>, %arg3: memref<1x64xf32, #tpu.memory_space<vmem>>, %arg4: memref<1x64xf32, #tpu.memory_space<vmem>>, %arg5: memref<1x64x64xbf16, #tpu.memory_space<vmem>>) attributes {dimension_semantics = [#tpu.dimension_semantics<parallel>], iteration_bounds = array<i64: 2>, scalar_prefetch = 0 : i64, scratch_operands = 0 : i64, tpu.core_type = #tpu.core_type<tc>, window_params = [{transform_indices = @transform_0, window_bounds = array<i64: 1, 4, 9, 9, 64>}, {pipeline_mode = #tpu.pipeline_mode<synchronous>, transform_indices = @transform_1, window_bounds = array<i64: 9, 64, 64>}, {pipeline_mode = #tpu.pipeline_mode<synchronous>, transform_indices = @transform_2, window_bounds = array<i64: 1, 64>}, {pipeline_mode = #tpu.pipeline_mode<synchronous>, transform_indices = @transform_3, window_bounds = array<i64: 1, 64>}, {transform_indices = @transform_4, window_bounds = array<i64: 1, 64, 64>}]} {
    %cst = arith.constant 0.000000e+00 : f32
    %0 = vector.broadcast %cst : f32 to vector<64x64xf32>
    %c0 = arith.constant 0 : index
    %c0_0 = arith.constant 0 : index
    %c0_1 = arith.constant 0 : index
    %c0_2 = arith.constant 0 : index
    %c0_3 = arith.constant 0 : index
    %1 = vector.load %arg1[%c0, %c0_0, %c0_1, %c0_2, %c0_3] : memref<1x4x9x9x64xbf16, #tpu.memory_space<vmem>>, vector<1x1x8x8x64xbf16>
    %2 = vector.shape_cast %1 : vector<1x1x8x8x64xbf16> to vector<8x8x64xbf16>
    %3 = vector.shape_cast %2 : vector<8x8x64xbf16> to vector<64x64xbf16>
    %c0_4 = arith.constant 0 : index
    %c0_5 = arith.constant 0 : index
    %c0_6 = arith.constant 0 : index
    %4 = vector.load %arg2[%c0_4, %c0_5, %c0_6] : memref<9x64x64xbf16, #tpu.memory_space<vmem>>, vector<1x64x64xbf16>
    %5 = vector.shape_cast %4 : vector<1x64x64xbf16> to vector<64x64xbf16>
    %cst_7 = arith.constant dense<0.000000e+00> : vector<64x64xf32>
    %6 = tpu.matmul %3, %5, %cst_7 {dimension_numbers = #tpu.dot_dimension_numbers<[1], [0], [0], [1], [0, 0, 1, 1], [], []>} : vector<64x64xbf16>, vector<64x64xbf16>, vector<64x64xf32> -> vector<64x64xf32>
    %7 = arith.addf %0, %6 : vector<64x64xf32>
    %c0_8 = arith.constant 0 : index
    %c1 = arith.constant 1 : index
    %c0_9 = arith.constant 0 : index
    %c0_10 = arith.constant 0 : index
    %c0_11 = arith.constant 0 : index
    %8 = vector.load %arg1[%c0_8, %c1, %c0_9, %c0_10, %c0_11] : memref<1x4x9x9x64xbf16, #tpu.memory_space<vmem>>, vector<1x1x8x8x64xbf16>
    %9 = vector.shape_cast %8 : vector<1x1x8x8x64xbf16> to vector<8x8x64xbf16>
    %10 = vector.shape_cast %9 : vector<8x8x64xbf16> to vector<64x64xbf16>
    %c1_12 = arith.constant 1 : index
    %c0_13 = arith.constant 0 : index
    %c0_14 = arith.constant 0 : index
    %11 = vector.load %arg2[%c1_12, %c0_13, %c0_14] : memref<9x64x64xbf16, #tpu.memory_space<vmem>>, vector<1x64x64xbf16>
    %12 = vector.shape_cast %11 : vector<1x64x64xbf16> to vector<64x64xbf16>
    %cst_15 = arith.constant dense<0.000000e+00> : vector<64x64xf32>
    %13 = tpu.matmul %10, %12, %cst_15 {dimension_numbers = #tpu.dot_dimension_numbers<[1], [0], [0], [1], [0, 0, 1, 1], [], []>} : vector<64x64xbf16>, vector<64x64xbf16>, vector<64x64xf32> -> vector<64x64xf32>
    %14 = arith.addf %7, %13 : vector<64x64xf32>
    %c0_16 = arith.constant 0 : index
    %c0_17 = arith.constant 0 : index
    %c0_18 = arith.constant 0 : index
    %c1_19 = arith.constant 1 : index
    %c0_20 = arith.constant 0 : index
    %15 = vector.load %arg1[%c0_16, %c0_17, %c0_18, %c1_19, %c0_20] : memref<1x4x9x9x64xbf16, #tpu.memory_space<vmem>>, vector<1x1x8x8x64xbf16>
    %16 = vector.shape_cast %15 : vector<1x1x8x8x64xbf16> to vector<8x8x64xbf16>
    %17 = vector.shape_cast %16 : vector<8x8x64xbf16> to vector<64x64xbf16>
    %c2 = arith.constant 2 : index
    %c0_21 = arith.constant 0 : index
    %c0_22 = arith.constant 0 : index
    %18 = vector.load %arg2[%c2, %c0_21, %c0_22] : memref<9x64x64xbf16, #tpu.memory_space<vmem>>, vector<1x64x64xbf16>
    %19 = vector.shape_cast %18 : vector<1x64x64xbf16> to vector<64x64xbf16>
    %cst_23 = arith.constant dense<0.000000e+00> : vector<64x64xf32>
    %20 = tpu.matmul %17, %19, %cst_23 {dimension_numbers = #tpu.dot_dimension_numbers<[1], [0], [0], [1], [0, 0, 1, 1], [], []>} : vector<64x64xbf16>, vector<64x64xbf16>, vector<64x64xf32> -> vector<64x64xf32>
    %21 = arith.addf %14, %20 : vector<64x64xf32>
    %c0_24 = arith.constant 0 : index
    %c2_25 = arith.constant 2 : index
    %c0_26 = arith.constant 0 : index
    %c0_27 = arith.constant 0 : index
    %c0_28 = arith.constant 0 : index
    %22 = vector.load %arg1[%c0_24, %c2_25, %c0_26, %c0_27, %c0_28] : memref<1x4x9x9x64xbf16, #tpu.memory_space<vmem>>, vector<1x1x8x8x64xbf16>
    %23 = vector.shape_cast %22 : vector<1x1x8x8x64xbf16> to vector<8x8x64xbf16>
    %24 = vector.shape_cast %23 : vector<8x8x64xbf16> to vector<64x64xbf16>
    %c3 = arith.constant 3 : index
    %c0_29 = arith.constant 0 : index
    %c0_30 = arith.constant 0 : index
    %25 = vector.load %arg2[%c3, %c0_29, %c0_30] : memref<9x64x64xbf16, #tpu.memory_space<vmem>>, vector<1x64x64xbf16>
    %26 = vector.shape_cast %25 : vector<1x64x64xbf16> to vector<64x64xbf16>
    %cst_31 = arith.constant dense<0.000000e+00> : vector<64x64xf32>
    %27 = tpu.matmul %24, %26, %cst_31 {dimension_numbers = #tpu.dot_dimension_numbers<[1], [0], [0], [1], [0, 0, 1, 1], [], []>} : vector<64x64xbf16>, vector<64x64xbf16>, vector<64x64xf32> -> vector<64x64xf32>
    %28 = arith.addf %21, %27 : vector<64x64xf32>
    %c0_32 = arith.constant 0 : index
    %c3_33 = arith.constant 3 : index
    %c0_34 = arith.constant 0 : index
    %c0_35 = arith.constant 0 : index
    %c0_36 = arith.constant 0 : index
    %29 = vector.load %arg1[%c0_32, %c3_33, %c0_34, %c0_35, %c0_36] : memref<1x4x9x9x64xbf16, #tpu.memory_space<vmem>>, vector<1x1x8x8x64xbf16>
    %30 = vector.shape_cast %29 : vector<1x1x8x8x64xbf16> to vector<8x8x64xbf16>
    %31 = vector.shape_cast %30 : vector<8x8x64xbf16> to vector<64x64xbf16>
    %c4 = arith.constant 4 : index
    %c0_37 = arith.constant 0 : index
    %c0_38 = arith.constant 0 : index
    %32 = vector.load %arg2[%c4, %c0_37, %c0_38] : memref<9x64x64xbf16, #tpu.memory_space<vmem>>, vector<1x64x64xbf16>
    %33 = vector.shape_cast %32 : vector<1x64x64xbf16> to vector<64x64xbf16>
    %cst_39 = arith.constant dense<0.000000e+00> : vector<64x64xf32>
    %34 = tpu.matmul %31, %33, %cst_39 {dimension_numbers = #tpu.dot_dimension_numbers<[1], [0], [0], [1], [0, 0, 1, 1], [], []>} : vector<64x64xbf16>, vector<64x64xbf16>, vector<64x64xf32> -> vector<64x64xf32>
    %35 = arith.addf %28, %34 : vector<64x64xf32>
    %c0_40 = arith.constant 0 : index
    %c2_41 = arith.constant 2 : index
    %c0_42 = arith.constant 0 : index
    %c1_43 = arith.constant 1 : index
    %c0_44 = arith.constant 0 : index
    %36 = vector.load %arg1[%c0_40, %c2_41, %c0_42, %c1_43, %c0_44] : memref<1x4x9x9x64xbf16, #tpu.memory_space<vmem>>, vector<1x1x8x8x64xbf16>
    %37 = vector.shape_cast %36 : vector<1x1x8x8x64xbf16> to vector<8x8x64xbf16>
    %38 = vector.shape_cast %37 : vector<8x8x64xbf16> to vector<64x64xbf16>
    %c5 = arith.constant 5 : index
    %c0_45 = arith.constant 0 : index
    %c0_46 = arith.constant 0 : index
    %39 = vector.load %arg2[%c5, %c0_45, %c0_46] : memref<9x64x64xbf16, #tpu.memory_space<vmem>>, vector<1x64x64xbf16>
    %40 = vector.shape_cast %39 : vector<1x64x64xbf16> to vector<64x64xbf16>
    %cst_47 = arith.constant dense<0.000000e+00> : vector<64x64xf32>
    %41 = tpu.matmul %38, %40, %cst_47 {dimension_numbers = #tpu.dot_dimension_numbers<[1], [0], [0], [1], [0, 0, 1, 1], [], []>} : vector<64x64xbf16>, vector<64x64xbf16>, vector<64x64xf32> -> vector<64x64xf32>
    %42 = arith.addf %35, %41 : vector<64x64xf32>
    %c0_48 = arith.constant 0 : index
    %c0_49 = arith.constant 0 : index
    %c1_50 = arith.constant 1 : index
    %c0_51 = arith.constant 0 : index
    %c0_52 = arith.constant 0 : index
    %43 = vector.load %arg1[%c0_48, %c0_49, %c1_50, %c0_51, %c0_52] : memref<1x4x9x9x64xbf16, #tpu.memory_space<vmem>>, vector<1x1x8x8x64xbf16>
    %44 = vector.shape_cast %43 : vector<1x1x8x8x64xbf16> to vector<8x8x64xbf16>
    %45 = vector.shape_cast %44 : vector<8x8x64xbf16> to vector<64x64xbf16>
    %c6 = arith.constant 6 : index
    %c0_53 = arith.constant 0 : index
    %c0_54 = arith.constant 0 : index
    %46 = vector.load %arg2[%c6, %c0_53, %c0_54] : memref<9x64x64xbf16, #tpu.memory_space<vmem>>, vector<1x64x64xbf16>
    %47 = vector.shape_cast %46 : vector<1x64x64xbf16> to vector<64x64xbf16>
    %cst_55 = arith.constant dense<0.000000e+00> : vector<64x64xf32>
    %48 = tpu.matmul %45, %47, %cst_55 {dimension_numbers = #tpu.dot_dimension_numbers<[1], [0], [0], [1], [0, 0, 1, 1], [], []>} : vector<64x64xbf16>, vector<64x64xbf16>, vector<64x64xf32> -> vector<64x64xf32>
    %49 = arith.addf %42, %48 : vector<64x64xf32>
    %c0_56 = arith.constant 0 : index
    %c1_57 = arith.constant 1 : index
    %c1_58 = arith.constant 1 : index
    %c0_59 = arith.constant 0 : index
    %c0_60 = arith.constant 0 : index
    %50 = vector.load %arg1[%c0_56, %c1_57, %c1_58, %c0_59, %c0_60] : memref<1x4x9x9x64xbf16, #tpu.memory_space<vmem>>, vector<1x1x8x8x64xbf16>
    %51 = vector.shape_cast %50 : vector<1x1x8x8x64xbf16> to vector<8x8x64xbf16>
    %52 = vector.shape_cast %51 : vector<8x8x64xbf16> to vector<64x64xbf16>
    %c7 = arith.constant 7 : index
    %c0_61 = arith.constant 0 : index
    %c0_62 = arith.constant 0 : index
    %53 = vector.load %arg2[%c7, %c0_61, %c0_62] : memref<9x64x64xbf16, #tpu.memory_space<vmem>>, vector<1x64x64xbf16>
    %54 = vector.shape_cast %53 : vector<1x64x64xbf16> to vector<64x64xbf16>
    %cst_63 = arith.constant dense<0.000000e+00> : vector<64x64xf32>
    %55 = tpu.matmul %52, %54, %cst_63 {dimension_numbers = #tpu.dot_dimension_numbers<[1], [0], [0], [1], [0, 0, 1, 1], [], []>} : vector<64x64xbf16>, vector<64x64xbf16>, vector<64x64xf32> -> vector<64x64xf32>
    %56 = arith.addf %49, %55 : vector<64x64xf32>
    %c0_64 = arith.constant 0 : index
    %c0_65 = arith.constant 0 : index
    %c1_66 = arith.constant 1 : index
    %c1_67 = arith.constant 1 : index
    %c0_68 = arith.constant 0 : index
    %57 = vector.load %arg1[%c0_64, %c0_65, %c1_66, %c1_67, %c0_68] : memref<1x4x9x9x64xbf16, #tpu.memory_space<vmem>>, vector<1x1x8x8x64xbf16>
    %58 = vector.shape_cast %57 : vector<1x1x8x8x64xbf16> to vector<8x8x64xbf16>
    %59 = vector.shape_cast %58 : vector<8x8x64xbf16> to vector<64x64xbf16>
    %c8 = arith.constant 8 : index
    %c0_69 = arith.constant 0 : index
    %c0_70 = arith.constant 0 : index
    %60 = vector.load %arg2[%c8, %c0_69, %c0_70] : memref<9x64x64xbf16, #tpu.memory_space<vmem>>, vector<1x64x64xbf16>
    %61 = vector.shape_cast %60 : vector<1x64x64xbf16> to vector<64x64xbf16>
    %cst_71 = arith.constant dense<0.000000e+00> : vector<64x64xf32>
    %62 = tpu.matmul %59, %61, %cst_71 {dimension_numbers = #tpu.dot_dimension_numbers<[1], [0], [0], [1], [0, 0, 1, 1], [], []>} : vector<64x64xbf16>, vector<64x64xbf16>, vector<64x64xf32> -> vector<64x64xf32>
    %63 = arith.addf %56, %62 : vector<64x64xf32>
    %c0_72 = arith.constant 0 : index
    %c0_73 = arith.constant 0 : index
    %64 = vector.load %arg3[%c0_72, %c0_73] : memref<1x64xf32, #tpu.memory_space<vmem>>, vector<1x64xf32>
    %65 = vector.broadcast %64 : vector<1x64xf32> to vector<64x64xf32>
    %66 = arith.mulf %63, %65 : vector<64x64xf32>
    %c0_74 = arith.constant 0 : index
    %c0_75 = arith.constant 0 : index
    %67 = vector.load %arg4[%c0_74, %c0_75] : memref<1x64xf32, #tpu.memory_space<vmem>>, vector<1x64xf32>
    %68 = vector.broadcast %67 : vector<1x64xf32> to vector<64x64xf32>
    %69 = arith.addf %66, %68 : vector<64x64xf32>
    %cst_76 = arith.constant 0.000000e+00 : f32
    %70 = vector.broadcast %cst_76 : f32 to vector<64x64xf32>
    %71 = arith.maximumf %69, %70 : vector<64x64xf32>
    %72 = arith.truncf %71 : vector<64x64xf32> to vector<64x64xbf16>
    %c0_77 = arith.constant 0 : index
    %c0_78 = arith.constant 0 : index
    %c0_79 = arith.constant 0 : index
    %73 = vector.load %arg5[%c0_77, %c0_78, %c0_79] : memref<1x64x64xbf16, #tpu.memory_space<vmem>>, vector<1x64x64xbf16>
    %74 = vector.shape_cast %73 : vector<1x64x64xbf16> to vector<64x64xbf16>
    %75 = vector.shape_cast %72 : vector<64x64xbf16> to vector<1x64x64xbf16>
    tpu.vector_store %arg5[%c0_77, %c0_78, %c0_79], %75 {strides = array<i32>} : memref<1x64x64xbf16, #tpu.memory_space<vmem>>, vector<1x64x64xbf16>,
    return
  }
  func.func @transform_0(%arg0: i32) -> (i32, i32, i32, i32, i32) {
    %c0_i32 = arith.constant 0 : i32
    %c0_i32_0 = arith.constant 0 : i32
    %c0_i32_1 = arith.constant 0 : i32
    %c0_i32_2 = arith.constant 0 : i32
    %c0_i32_3 = arith.constant 0 : i32
    return %arg0, %c0_i32, %c0_i32_0, %c0_i32_1, %c0_i32_2 : i32, i32, i32, i32, i32
  }
  func.func @transform_1(%arg0: i32) -> (i32, i32, i32) {
    %c0_i32 = arith.constant 0 : i32
    %c0_i32_0 = arith.constant 0 : i32
    %c0_i32_1 = arith.constant 0 : i32
    %c0_i32_2 = arith.constant 0 : i32
    return %c0_i32, %c0_i32_0, %c0_i32_1 : i32, i32, i32
  }
  func.func @transform_2(%arg0: i32) -> (i32, i32) {
    %c0_i32 = arith.constant 0 : i32
    %c0_i32_0 = arith.constant 0 : i32
    %c0_i32_1 = arith.constant 0 : i32
    return %c0_i32, %c0_i32_0 : i32, i32
  }
  func.func @transform_3(%arg0: i32) -> (i32, i32) {
    %c0_i32 = arith.constant 0 : i32
    %c0_i32_0 = arith.constant 0 : i32
    %c0_i32_1 = arith.constant 0 : i32
    return %c0_i32, %c0_i32_0 : i32, i32
  }
  func.func @transform_4(%arg0: i32) -> (i32, i32, i32) {
    %c0_i32 = arith.constant 0 : i32
    %c0_i32_0 = arith.constant 0 : i32
    %c0_i32_1 = arith.constant 0 : i32
    return %arg0, %c0_i32, %c0_i32_0 : i32, i32, i32
  }
}

module attributes {stable_mosaic.version = 11 : i64} {
  func.func @_mm_bn_kernel(%arg0: i32, %arg1: i32, %arg2: i32, %arg3: memref<128x128xbf16, #tpu.memory_space<vmem>>, %arg4: memref<128x128xbf16, #tpu.memory_space<vmem>>, %arg5: memref<1x128xf32, #tpu.memory_space<vmem>>, %arg6: memref<1x128xf32, #tpu.memory_space<vmem>>, %arg7: memref<128x128xbf16, #tpu.memory_space<vmem>>, %arg8: memref<128x128xf32, #tpu.memory_space<vmem>>) attributes {dimension_semantics = [#tpu.dimension_semantics<parallel>, #tpu.dimension_semantics<parallel>, #tpu.dimension_semantics<arbitrary>], iteration_bounds = array<i64: 1, 1, 1>, scalar_prefetch = 0 : i64, scratch_operands = 1 : i64, tpu.core_type = #tpu.core_type<tc>, window_params = [{transform_indices = @transform_0, window_bounds = array<i64: 128, 128>}, {transform_indices = @transform_1, window_bounds = array<i64: 128, 128>}, {transform_indices = @transform_2, window_bounds = array<i64: 1, 128>}, {transform_indices = @transform_3, window_bounds = array<i64: 1, 128>}, {transform_indices = @transform_4, window_bounds = array<i64: 128, 128>}]} {
    %c0_i32 = arith.constant 0 : i32
    %0 = arith.cmpi eq, %arg2, %c0_i32 : i32
    %1 = arith.extui %0 : i1 to i32
    %c0_i32_0 = arith.constant 0 : i32
    %2 = arith.cmpi ne, %1, %c0_i32_0 : i32
    scf.if %2 {
      %cst_10 = arith.constant 0.000000e+00 : f32
      %12 = vector.broadcast %cst_10 : f32 to vector<128x128xf32>
      %c0_11 = arith.constant 0 : index
      %c0_12 = arith.constant 0 : index
      %13 = vector.load %arg8[%c0_11, %c0_12] : memref<128x128xf32, #tpu.memory_space<vmem>>, vector<128x128xf32>
      tpu.vector_store %arg8[%c0_11, %c0_12], %12 {strides = array<i32>} : memref<128x128xf32, #tpu.memory_space<vmem>>, vector<128x128xf32>,
    } else {
    }
    %c0 = arith.constant 0 : index
    %c0_1 = arith.constant 0 : index
    %3 = vector.load %arg8[%c0, %c0_1] : memref<128x128xf32, #tpu.memory_space<vmem>>, vector<128x128xf32>
    %c0_2 = arith.constant 0 : index
    %c0_3 = arith.constant 0 : index
    %4 = vector.load %arg3[%c0_2, %c0_3] : memref<128x128xbf16, #tpu.memory_space<vmem>>, vector<128x128xbf16>
    %c0_4 = arith.constant 0 : index
    %c0_5 = arith.constant 0 : index
    %5 = vector.load %arg4[%c0_4, %c0_5] : memref<128x128xbf16, #tpu.memory_space<vmem>>, vector<128x128xbf16>
    %cst = arith.constant dense<0.000000e+00> : vector<128x128xf32>
    %6 = tpu.matmul %4, %5, %cst {dimension_numbers = #tpu.dot_dimension_numbers<[1], [0], [0], [1], [0, 0, 1, 1], [], []>} : vector<128x128xbf16>, vector<128x128xbf16>, vector<128x128xf32> -> vector<128x128xf32>
    %7 = arith.addf %3, %6 : vector<128x128xf32>
    %c0_6 = arith.constant 0 : index
    %c0_7 = arith.constant 0 : index
    %8 = vector.load %arg8[%c0_6, %c0_7] : memref<128x128xf32, #tpu.memory_space<vmem>>, vector<128x128xf32>
    tpu.vector_store %arg8[%c0_6, %c0_7], %7 {strides = array<i32>} : memref<128x128xf32, #tpu.memory_space<vmem>>, vector<128x128xf32>,
    %c0_i32_8 = arith.constant 0 : i32
    %9 = arith.cmpi eq, %arg2, %c0_i32_8 : i32
    %10 = arith.extui %9 : i1 to i32
    %c0_i32_9 = arith.constant 0 : i32
    %11 = arith.cmpi ne, %10, %c0_i32_9 : i32
    scf.if %11 {
      %c0_10 = arith.constant 0 : index
      %c0_11 = arith.constant 0 : index
      %12 = vector.load %arg8[%c0_10, %c0_11] : memref<128x128xf32, #tpu.memory_space<vmem>>, vector<128x128xf32>
      %c0_12 = arith.constant 0 : index
      %c0_13 = arith.constant 0 : index
      %13 = vector.load %arg5[%c0_12, %c0_13] : memref<1x128xf32, #tpu.memory_space<vmem>>, vector<1x128xf32>
      %14 = vector.broadcast %13 : vector<1x128xf32> to vector<128x128xf32>
      %15 = arith.mulf %12, %14 : vector<128x128xf32>
      %c0_14 = arith.constant 0 : index
      %c0_15 = arith.constant 0 : index
      %16 = vector.load %arg6[%c0_14, %c0_15] : memref<1x128xf32, #tpu.memory_space<vmem>>, vector<1x128xf32>
      %17 = vector.broadcast %16 : vector<1x128xf32> to vector<128x128xf32>
      %18 = arith.addf %15, %17 : vector<128x128xf32>
      %19 = arith.truncf %18 : vector<128x128xf32> to vector<128x128xbf16>
      %c0_16 = arith.constant 0 : index
      %c0_17 = arith.constant 0 : index
      %20 = vector.load %arg7[%c0_16, %c0_17] : memref<128x128xbf16, #tpu.memory_space<vmem>>, vector<128x128xbf16>
      tpu.vector_store %arg7[%c0_16, %c0_17], %19 {strides = array<i32>} : memref<128x128xbf16, #tpu.memory_space<vmem>>, vector<128x128xbf16>,
    } else {
    }
    return
  }
  func.func @transform_0(%arg0: i32, %arg1: i32, %arg2: i32) -> (i32, i32) {
    %c0_i32 = arith.constant 0 : i32
    return %arg0, %arg2 : i32, i32
  }
  func.func @transform_1(%arg0: i32, %arg1: i32, %arg2: i32) -> (i32, i32) {
    %c0_i32 = arith.constant 0 : i32
    return %arg2, %arg1 : i32, i32
  }
  func.func @transform_2(%arg0: i32, %arg1: i32, %arg2: i32) -> (i32, i32) {
    %c0_i32 = arith.constant 0 : i32
    %c0_i32_0 = arith.constant 0 : i32
    return %c0_i32, %arg1 : i32, i32
  }
  func.func @transform_3(%arg0: i32, %arg1: i32, %arg2: i32) -> (i32, i32) {
    %c0_i32 = arith.constant 0 : i32
    %c0_i32_0 = arith.constant 0 : i32
    return %c0_i32, %arg1 : i32, i32
  }
  func.func @transform_4(%arg0: i32, %arg1: i32, %arg2: i32) -> (i32, i32) {
    %c0_i32 = arith.constant 0 : i32
    return %arg0, %arg1 : i32, i32
  }
}

module attributes {stable_mosaic.version = 11 : i64} {
  func.func @_mm_bn_res_kernel(%arg0: i32, %arg1: i32, %arg2: i32, %arg3: memref<128x128xbf16, #tpu.memory_space<vmem>>, %arg4: memref<128x128xbf16, #tpu.memory_space<vmem>>, %arg5: memref<1x128xf32, #tpu.memory_space<vmem>>, %arg6: memref<1x128xf32, #tpu.memory_space<vmem>>, %arg7: memref<128x128xbf16, #tpu.memory_space<vmem>>, %arg8: memref<128x128xf32, #tpu.memory_space<vmem>>, %arg9: memref<128x128xf32, #tpu.memory_space<vmem>>) attributes {dimension_semantics = [#tpu.dimension_semantics<parallel>, #tpu.dimension_semantics<parallel>, #tpu.dimension_semantics<arbitrary>], iteration_bounds = array<i64: 1, 1, 1>, scalar_prefetch = 0 : i64, scratch_operands = 1 : i64, tpu.core_type = #tpu.core_type<tc>, window_params = [{transform_indices = @transform_0, window_bounds = array<i64: 128, 128>}, {transform_indices = @transform_1, window_bounds = array<i64: 128, 128>}, {transform_indices = @transform_2, window_bounds = array<i64: 1, 128>}, {transform_indices = @transform_3, window_bounds = array<i64: 1, 128>}, {transform_indices = @transform_4, window_bounds = array<i64: 128, 128>}, {transform_indices = @transform_5, window_bounds = array<i64: 128, 128>}]} {
    %c0_i32 = arith.constant 0 : i32
    %0 = arith.cmpi eq, %arg2, %c0_i32 : i32
    %1 = arith.extui %0 : i1 to i32
    %c0_i32_0 = arith.constant 0 : i32
    %2 = arith.cmpi ne, %1, %c0_i32_0 : i32
    scf.if %2 {
      %cst_10 = arith.constant 0.000000e+00 : f32
      %12 = vector.broadcast %cst_10 : f32 to vector<128x128xf32>
      %c0_11 = arith.constant 0 : index
      %c0_12 = arith.constant 0 : index
      %13 = vector.load %arg9[%c0_11, %c0_12] : memref<128x128xf32, #tpu.memory_space<vmem>>, vector<128x128xf32>
      tpu.vector_store %arg9[%c0_11, %c0_12], %12 {strides = array<i32>} : memref<128x128xf32, #tpu.memory_space<vmem>>, vector<128x128xf32>,
    } else {
    }
    %c0 = arith.constant 0 : index
    %c0_1 = arith.constant 0 : index
    %3 = vector.load %arg9[%c0, %c0_1] : memref<128x128xf32, #tpu.memory_space<vmem>>, vector<128x128xf32>
    %c0_2 = arith.constant 0 : index
    %c0_3 = arith.constant 0 : index
    %4 = vector.load %arg3[%c0_2, %c0_3] : memref<128x128xbf16, #tpu.memory_space<vmem>>, vector<128x128xbf16>
    %c0_4 = arith.constant 0 : index
    %c0_5 = arith.constant 0 : index
    %5 = vector.load %arg4[%c0_4, %c0_5] : memref<128x128xbf16, #tpu.memory_space<vmem>>, vector<128x128xbf16>
    %cst = arith.constant dense<0.000000e+00> : vector<128x128xf32>
    %6 = tpu.matmul %4, %5, %cst {dimension_numbers = #tpu.dot_dimension_numbers<[1], [0], [0], [1], [0, 0, 1, 1], [], []>} : vector<128x128xbf16>, vector<128x128xbf16>, vector<128x128xf32> -> vector<128x128xf32>
    %7 = arith.addf %3, %6 : vector<128x128xf32>
    %c0_6 = arith.constant 0 : index
    %c0_7 = arith.constant 0 : index
    %8 = vector.load %arg9[%c0_6, %c0_7] : memref<128x128xf32, #tpu.memory_space<vmem>>, vector<128x128xf32>
    tpu.vector_store %arg9[%c0_6, %c0_7], %7 {strides = array<i32>} : memref<128x128xf32, #tpu.memory_space<vmem>>, vector<128x128xf32>,
    %c0_i32_8 = arith.constant 0 : i32
    %9 = arith.cmpi eq, %arg2, %c0_i32_8 : i32
    %10 = arith.extui %9 : i1 to i32
    %c0_i32_9 = arith.constant 0 : i32
    %11 = arith.cmpi ne, %10, %c0_i32_9 : i32
    scf.if %11 {
      %c0_10 = arith.constant 0 : index
      %c0_11 = arith.constant 0 : index
      %12 = vector.load %arg9[%c0_10, %c0_11] : memref<128x128xf32, #tpu.memory_space<vmem>>, vector<128x128xf32>
      %c0_12 = arith.constant 0 : index
      %c0_13 = arith.constant 0 : index
      %13 = vector.load %arg5[%c0_12, %c0_13] : memref<1x128xf32, #tpu.memory_space<vmem>>, vector<1x128xf32>
      %14 = vector.broadcast %13 : vector<1x128xf32> to vector<128x128xf32>
      %15 = arith.mulf %12, %14 : vector<128x128xf32>
      %c0_14 = arith.constant 0 : index
      %c0_15 = arith.constant 0 : index
      %16 = vector.load %arg6[%c0_14, %c0_15] : memref<1x128xf32, #tpu.memory_space<vmem>>, vector<1x128xf32>
      %17 = vector.broadcast %16 : vector<1x128xf32> to vector<128x128xf32>
      %18 = arith.addf %15, %17 : vector<128x128xf32>
      %c0_16 = arith.constant 0 : index
      %c0_17 = arith.constant 0 : index
      %19 = vector.load %arg7[%c0_16, %c0_17] : memref<128x128xbf16, #tpu.memory_space<vmem>>, vector<128x128xbf16>
      %20 = arith.extf %19 : vector<128x128xbf16> to vector<128x128xf32>
      %21 = arith.addf %18, %20 : vector<128x128xf32>
      %cst_18 = arith.constant 0.000000e+00 : f32
      %22 = vector.broadcast %cst_18 : f32 to vector<128x128xf32>
      %23 = arith.maximumf %21, %22 : vector<128x128xf32>
      %c0_19 = arith.constant 0 : index
      %c0_20 = arith.constant 0 : index
      %24 = vector.load %arg8[%c0_19, %c0_20] : memref<128x128xf32, #tpu.memory_space<vmem>>, vector<128x128xf32>
      tpu.vector_store %arg8[%c0_19, %c0_20], %23 {strides = array<i32>} : memref<128x128xf32, #tpu.memory_space<vmem>>, vector<128x128xf32>,
    } else {
    }
    return
  }
  func.func @transform_0(%arg0: i32, %arg1: i32, %arg2: i32) -> (i32, i32) {
    %c0_i32 = arith.constant 0 : i32
    return %arg0, %arg2 : i32, i32
  }
  func.func @transform_1(%arg0: i32, %arg1: i32, %arg2: i32) -> (i32, i32) {
    %c0_i32 = arith.constant 0 : i32
    return %arg2, %arg1 : i32, i32
  }
  func.func @transform_2(%arg0: i32, %arg1: i32, %arg2: i32) -> (i32, i32) {
    %c0_i32 = arith.constant 0 : i32
    %c0_i32_0 = arith.constant 0 : i32
    return %c0_i32, %arg1 : i32, i32
  }
  func.func @transform_3(%arg0: i32, %arg1: i32, %arg2: i32) -> (i32, i32) {
    %c0_i32 = arith.constant 0 : i32
    %c0_i32_0 = arith.constant 0 : i32
    return %c0_i32, %arg1 : i32, i32
  }
  func.func @transform_4(%arg0: i32, %arg1: i32, %arg2: i32) -> (i32, i32) {
    %c0_i32 = arith.constant 0 : i32
    return %arg0, %arg1 : i32, i32
  }
  func.func @transform_5(%arg0: i32, %arg1: i32, %arg2: i32) -> (i32, i32) {
    %c0_i32 = arith.constant 0 : i32
    return %arg0, %arg1 : i32, i32
  }
}

</mosaic_0001>

<bundles_post_ra>
// kernel: encoder_bottleneck_forward.5
= control target key start
LH: loop header
LB: loop body
LE: loop exit
PB: predicated region body
PF: predicated region fallthrough
CT: control target
= control target key end

     0   :  { %s1367_s15 = smov 0   ;;  %s1369_s16 = smov 0   ;;  %s1544_s0 = inlined_call_operand.vmem [shape: bf16[512,128], index: 0, kind: input, shape index: {}]   ;;  %s1545_s1 = inlined_call_operand.vmem [shape: bf16[128,128], index: 1, kind: input, shape index: {}]   ;;  %s1546_s2 = inlined_call_operand.vmem [shape: f32[1,128], index: 2, kind: input, shape index: {}]   ;;  %s1547_s3 = inlined_call_operand.vmem [shape: f32[1,128], index: 3, kind: input, shape index: {}]   ;;  %s1548_s4 = inlined_call_operand.vmem [shape: bf16[512,128], index: 4, kind: output, shape index: {}]  }
   0x1   :  { %s1371_s17 = smov 0  }
   0x2 LB: > { %s33_s18 = sadd.s32 1, %s1336_s16  ;;  %p1046_p0 = scmp.ge.s32.totalorder %s1340_s17, 1  ;;  %s1340_s17 = sphi %s1371_s17, %s14_s17   ;;  %s1336_s16 = sphi %s1369_s16, %s1550_s16   ;;  %s1332_s15 = sphi %s1367_s15, %s1549_s15  }
   0x3   : > { %p35_p1 = scmp.ge.s32.totalorder %s33_s18, 2  ;;  %p221_p2 = scmp.lt.s32.totalorder %s1340_s17, 3 }
   0x5   : > { %s1552_s18 = smov (%p35_p1, %s33_s18), 0  ;;  %p222_p3 = pnand %p1046_p0, %p221_p2 }
   0x6   : > { %s1047_s27 = sshll.u32 (!%p222_p3), %s1332_s15, 5 }
   0x7   : > { %225 = sbr.rel (%p222_p3) target bundleno = 243 (0xf3), region = 36  ;;  %p268_p4 = scmp.lt.s32.totalorder (!%p222_p3), %s1047_s27, 63 }
   0xc   : > { %v1172_v0 = vld [vmem:[%s1545_s1 + $0x38] sm:$0xff]  ;;  %v1171_v1 = vld [vmem:[%s1545_s1 + $0x30] sm:$0xff]  ;;  %v1170_v2 = vld [vmem:[%s1545_s1 + $0x28] sm:$0xff]  ;;  %s1554_s27 = smov (!%p268_p4, %s1047_s27), 63 }
   0xd   : > { %560 = vmatpush.bf16.msra.mxu0 %v1172_v0  ;;  %1268 = vmatpush.bf16.msra.mxu1 %v1172_v0  ;;  %v1169_v3 = vld [vmem:[%s1545_s1 + $0x20] sm:$0xff]  ;;  %v1168_v4 = vld [vmem:[%s1545_s1 + $0x18] sm:$0xff]  ;;  %v1167_v5 = vld [vmem:[%s1545_s1 + $0x10] sm:$0xff]  ;;  %s1048_s8 = sshll.u32 %s1554_s27, 2 }
   0xe   : > { %1269 = vmatpush.bf16.msra.mxu2 %v1172_v0  ;;  %1270 = vmatpush.bf16.msra.mxu3 %v1172_v0  ;;  %v1166_v6 = vld [vmem:[%s1545_s1 + $0x8] sm:$0xff]  ;;  %v1165_v7 = vld [vmem:[%s1545_s1] sm:$0xff]  ;;  %s1420_s13 = scalar_lea.vmem %s1544_s0, %s1048_s8  ;;  %s1463_s23 = scalar_lea.vmem %s1548_s4, %s1048_s8 }
   0xf   : > { %v1149_v8 = vld [vmem:[%s1420_s13] sm:$0xff]  ;;  %v1150_v12 = vld [vmem:[%s1420_s13 + $0x8] sm:$0xff]  ;;  %v1151_v16 = vld [vmem:[%s1420_s13 + $0x10] sm:$0xff] }
  0x10   : > { %v1153_v9 = vld [vmem:[%s1420_s13 + $0x20] sm:$0xff]  ;;  %v1154_v13 = vld [vmem:[%s1420_s13 + $0x28] sm:$0xff]  ;;  %v1155_v17 = vld [vmem:[%s1420_s13 + $0x30] sm:$0xff] }
  0x11   : > { %561 = vmatpush.bf16.msra.mxu0 %v1171_v1  ;;  %1271 = vmatpush.bf16.msra.mxu1 %v1171_v1  ;;  %v1157_v10 = vld [vmem:[%s1420_s13 + $0x40] sm:$0xff]  ;;  %v1158_v14 = vld [vmem:[%s1420_s13 + $0x48] sm:$0xff]  ;;  %v1159_v18 = vld [vmem:[%s1420_s13 + $0x50] sm:$0xff] }
  0x12   : > { %1272 = vmatpush.bf16.msra.mxu2 %v1171_v1  ;;  %1273 = vmatpush.bf16.msra.mxu3 %v1171_v1  ;;  %v1161_v11 = vld [vmem:[%s1420_s13 + $0x60] sm:$0xff]  ;;  %v1162_v15 = vld [vmem:[%s1420_s13 + $0x68] sm:$0xff]  ;;  %v1163_v19 = vld [vmem:[%s1420_s13 + $0x70] sm:$0xff] }
  0x13   : > { %v1152_v20 = vld [vmem:[%s1420_s13 + $0x18] sm:$0xff]  ;;  %v1441_v26 = vld [vmem:[%s1546_s2] ss:$0 sm:$0xff] }
  0x14   : > { %v1156_v21 = vld [vmem:[%s1420_s13 + $0x38] sm:$0xff]  ;;  %v1447_v28 = vld [vmem:[%s1547_s3] ss:$0 sm:$0xff] }
  0x15   : > { %562 = vmatpush.bf16.msra.mxu0 %v1170_v2  ;;  %1274 = vmatpush.bf16.msra.mxu1 %v1170_v2  ;;  %v1160_v22 = vld [vmem:[%s1420_s13 + $0x58] sm:$0xff] }
  0x16   : > { %1275 = vmatpush.bf16.msra.mxu2 %v1170_v2  ;;  %1276 = vmatpush.bf16.msra.mxu3 %v1170_v2  ;;  %v1164_v23 = vld [vmem:[%s1420_s13 + $0x78] sm:$0xff] }
  0x19   : > { %563 = vmatpush.bf16.msra.mxu0 %v1169_v3  ;;  %1277 = vmatpush.bf16.msra.mxu1 %v1169_v3 }
  0x1a   : > { %1278 = vmatpush.bf16.msra.mxu2 %v1169_v3  ;;  %1279 = vmatpush.bf16.msra.mxu3 %v1169_v3 }
  0x1d   : > { %564 = vmatpush.bf16.msra.mxu0 %v1168_v4  ;;  %1280 = vmatpush.bf16.msra.mxu1 %v1168_v4 }
  0x1e   : > { %1281 = vmatpush.bf16.msra.mxu2 %v1168_v4  ;;  %1282 = vmatpush.bf16.msra.mxu3 %v1168_v4 }
  0x21   : > { %565 = vmatpush.bf16.msra.mxu0 %v1167_v5  ;;  %1283 = vmatpush.bf16.msra.mxu1 %v1167_v5 }
  0x22   : > { %1284 = vmatpush.bf16.msra.mxu2 %v1167_v5  ;;  %1285 = vmatpush.bf16.msra.mxu3 %v1167_v5 }
  0x25   : > { %566 = vmatpush.bf16.msra.mxu0 %v1166_v6  ;;  %1286 = vmatpush.bf16.msra.mxu1 %v1166_v6 }
  0x26   : > { %1287 = vmatpush.bf16.msra.mxu2 %v1166_v6  ;;  %1288 = vmatpush.bf16.msra.mxu3 %v1166_v6 }
  0x29   : > { %567 = vmatpush.bf16.msra.mxu0 %v1165_v7  ;;  %1289 = vmatpush.bf16.msra.mxu1 %v1165_v7 }
  0x2a   : > { %1290 = vmatpush.bf16.msra.mxu2 %v1165_v7  ;;  %1291 = vmatpush.bf16.msra.mxu3 %v1165_v7 }
  0x2c   : > { %568 = vmatmul.bf16.vlgmr.msra.gmra.mxu0 %v1149_v8  ;;  %588 = vmatmul.bf16.vlgmr.msra.gmra.mxu1 %v1153_v9 }
  0x2d   : > { %608 = vmatmul.bf16.vlgmr.msra.gmra.mxu2 %v1157_v10  ;;  %628 = vmatmul.bf16.vlgmr.msra.gmra.mxu3 %v1161_v11 }
  0x3c   : > { %573 = vmatmul.bf16.gmra.mxu0 %v1150_v12  ;;  %593 = vmatmul.bf16.gmra.mxu1 %v1154_v13 }
  0x3d   : > { %613 = vmatmul.bf16.gmra.mxu2 %v1158_v14  ;;  %633 = vmatmul.bf16.gmra.mxu3 %v1162_v15 }
  0x4c   : > { %578 = vmatmul.bf16.gmra.mxu0 %v1151_v16  ;;  %598 = vmatmul.bf16.gmra.mxu1 %v1155_v17 }
  0x4d   : > { %618 = vmatmul.bf16.gmra.mxu2 %v1159_v18  ;;  %638 = vmatmul.bf16.gmra.mxu3 %v1163_v19 }
  0x5c   : > { %583 = vmatmul.bf16.gmra.mxu0 %v1152_v20  ;;  %603 = vmatmul.bf16.gmra.mxu1 %v1156_v21 }
  0x5d   : > { %623 = vmatmul.bf16.gmra.mxu2 %v1160_v22  ;;  %643 = vmatmul.bf16.gmra.mxu3 %v1164_v23 }
  0xa9   : > { %v569_v24 = vpop.f32.mrf.mxu0  ;;  %v589_v25 = vpop.f32.mrf.mxu1 }
  0xaa   : > { %v752_v27 = vmul.f32 %v1441_v26, %v569_v24  ;;  %v760_v29 = vmul.f32 %v1441_v26, %v589_v25 }
  0xac   : > { %v788_v34 = vadd.f32 %v1447_v28, %v752_v27  ;;  %v796_v35 = vadd.f32 %v1447_v28, %v760_v29 }
  0xae   : > { %v820_v42 = vmax.f32 %v788_v34, 0.0  ;;  %v828_v43 = vmax.f32 %v796_v35, 0.0 }
  0xb0   : > { %v609_v30 = vpop.f32.mrf.mxu2  ;;  %v629_v31 = vpop.f32.mrf.mxu3 }
  0xb1   : > { %v571_v32 = vpop.f32.mrf.mxu0  ;;  %v591_v33 = vpop.f32.mrf.mxu1  ;;  %v768_v40 = vmul.f32 %v1441_v26, %v609_v30  ;;  %v776_v41 = vmul.f32 %v1441_v26, %v629_v31 }
  0xb2   : > { %v753_v36 = vmul.f32 %v1441_v26, %v571_v32  ;;  %v761_v37 = vmul.f32 %v1441_v26, %v591_v33 }
  0xb3   : > { %v804_v50 = vadd.f32 %v1447_v28, %v768_v40  ;;  %v812_v51 = vadd.f32 %v1447_v28, %v776_v41 }
  0xb4   : > { %v789_v38 = vadd.f32 %v1447_v28, %v753_v36  ;;  %v797_v39 = vadd.f32 %v1447_v28, %v761_v37 }
  0xb5   : > { %v836_v58 = vmax.f32 %v804_v50, 0.0  ;;  %v844_v59 = vmax.f32 %v812_v51, 0.0 }
  0xb6   : > { %v821_v44 = vmax.f32 %v789_v38, 0.0  ;;  %v829_v45 = vmax.f32 %v797_v39, 0.0 }
  0xb8   : > { %v1176_v46 = vpack.c.bf16 %v821_v44, %v820_v42  ;;  %v1196_v47 = vpack.c.bf16 %v829_v45, %v828_v43  ;;  %v611_v48 = vpop.f32.mrf.mxu2  ;;  %v631_v49 = vpop.f32.mrf.mxu3 }
  0xb9   : > { %v769_v52 = vmul.f32 %v1441_v26, %v611_v48  ;;  %v777_v53 = vmul.f32 %v1441_v26, %v631_v49  ;;  %v574_v54 = vpop.f32.mrf.mxu0  ;;  %v594_v55 = vpop.f32.mrf.mxu1 }
  0xba   : > { %1177 = vst [vmem:[%s1463_s23] sm:$0xff] %v1176_v46   ;;  %v754_v62 = vmul.f32 %v1441_v26, %v574_v54  ;;  %v762_v63 = vmul.f32 %v1441_v26, %v594_v55 }
  0xbb   : > { %1256 = vst [vmem:[%s1463_s23 + $0x20] sm:$0xff] %v1196_v47   ;;  %v805_v56 = vadd.f32 %v1447_v28, %v769_v52  ;;  %v813_v57 = vadd.f32 %v1447_v28, %v777_v53 }
  0xbc   : > { %v790_v6 = vadd.f32 %v1447_v28, %v754_v62  ;;  %v798_v7 = vadd.f32 %v1447_v28, %v762_v63 }
  0xbd   : > { %v837_v60 = vmax.f32 %v805_v56, 0.0  ;;  %v845_v61 = vmax.f32 %v813_v57, 0.0 }
  0xbe   : > { %v822_v14 = vmax.f32 %v790_v6, 0.0  ;;  %v830_v15 = vmax.f32 %v798_v7, 0.0 }
  0xbf   : > { %v1216_v0 = vpack.c.bf16 %v837_v60, %v836_v58  ;;  %v1236_v1 = vpack.c.bf16 %v845_v61, %v844_v59 }
  0xc0   : > { %v614_v2 = vpop.f32.mrf.mxu2  ;;  %v634_v3 = vpop.f32.mrf.mxu3 }
  0xc1   : > { %1260 = vst [vmem:[%s1463_s23 + $0x40] sm:$0xff] %v1216_v0   ;;  %v576_v4 = vpop.f32.mrf.mxu0  ;;  %v596_v5 = vpop.f32.mrf.mxu1  ;;  %v770_v12 = vmul.f32 %v1441_v26, %v614_v2  ;;  %v778_v13 = vmul.f32 %v1441_v26, %v634_v3 }
  0xc2   : > { %1264 = vst [vmem:[%s1463_s23 + $0x60] sm:$0xff] %v1236_v1   ;;  %v755_v8 = vmul.f32 %v1441_v26, %v576_v4  ;;  %v763_v9 = vmul.f32 %v1441_v26, %v596_v5 }
  0xc3   : > { %v806_v22 = vadd.f32 %v1447_v28, %v770_v12  ;;  %v814_v23 = vadd.f32 %v1447_v28, %v778_v13 }
  0xc4   : > { %v791_v10 = vadd.f32 %v1447_v28, %v755_v8  ;;  %v799_v11 = vadd.f32 %v1447_v28, %v763_v9 }
  0xc5   : > { %v838_v32 = vmax.f32 %v806_v22, 0.0  ;;  %v846_v33 = vmax.f32 %v814_v23, 0.0 }
  0xc6   : > { %v823_v16 = vmax.f32 %v791_v10, 0.0  ;;  %v831_v17 = vmax.f32 %v799_v11, 0.0 }
  0xc8   : > { %v1181_v18 = vpack.c.bf16 %v823_v16, %v822_v14  ;;  %v1201_v19 = vpack.c.bf16 %v831_v17, %v830_v15  ;;  %v616_v20 = vpop.f32.mrf.mxu2  ;;  %v636_v21 = vpop.f32.mrf.mxu3 }
  0xc9   : > { %v771_v24 = vmul.f32 %v1441_v26, %v616_v20  ;;  %v779_v25 = vmul.f32 %v1441_v26, %v636_v21  ;;  %v579_v27 = vpop.f32.mrf.mxu0  ;;  %v599_v29 = vpop.f32.mrf.mxu1 }
  0xca   : > { %1253 = vst [vmem:[%s1463_s23 + $0x8] sm:$0xff] %v1181_v18   ;;  %v756_v36 = vmul.f32 %v1441_v26, %v579_v27  ;;  %v764_v37 = vmul.f32 %v1441_v26, %v599_v29 }
  0xcb   : > { %1257 = vst [vmem:[%s1463_s23 + $0x28] sm:$0xff] %v1201_v19   ;;  %v807_v30 = vadd.f32 %v1447_v28, %v771_v24  ;;  %v815_v31 = vadd.f32 %v1447_v28, %v779_v25 }
  0xcc   : > { %v792_v44 = vadd.f32 %v1447_v28, %v756_v36  ;;  %v800_v45 = vadd.f32 %v1447_v28, %v764_v37 }
  0xcd   : > { %v839_v34 = vmax.f32 %v807_v30, 0.0  ;;  %v847_v35 = vmax.f32 %v815_v31, 0.0 }
  0xce   : > { %v824_v52 = vmax.f32 %v792_v44, 0.0  ;;  %v832_v53 = vmax.f32 %v800_v45, 0.0 }
  0xcf   : > { %v1221_v38 = vpack.c.bf16 %v839_v34, %v838_v32  ;;  %v1241_v39 = vpack.c.bf16 %v847_v35, %v846_v33 }
  0xd0   : > { %v619_v40 = vpop.f32.mrf.mxu2  ;;  %v639_v41 = vpop.f32.mrf.mxu3 }
  0xd1   : > { %1261 = vst [vmem:[%s1463_s23 + $0x48] sm:$0xff] %v1221_v38   ;;  %v581_v42 = vpop.f32.mrf.mxu0  ;;  %v601_v43 = vpop.f32.mrf.mxu1  ;;  %v772_v50 = vmul.f32 %v1441_v26, %v619_v40  ;;  %v780_v51 = vmul.f32 %v1441_v26, %v639_v41 }
  0xd2   : > { %1265 = vst [vmem:[%s1463_s23 + $0x68] sm:$0xff] %v1241_v39   ;;  %v757_v46 = vmul.f32 %v1441_v26, %v581_v42  ;;  %v765_v47 = vmul.f32 %v1441_v26, %v601_v43 }
  0xd3   : > { %v808_v60 = vadd.f32 %v1447_v28, %v772_v50  ;;  %v816_v61 = vadd.f32 %v1447_v28, %v780_v51 }
  0xd4   : > { %v793_v48 = vadd.f32 %v1447_v28, %v757_v46  ;;  %v801_v49 = vadd.f32 %v1447_v28, %v765_v47 }
  0xd5   : > { %v840_v4 = vmax.f32 %v808_v60, 0.0  ;;  %v848_v5 = vmax.f32 %v816_v61, 0.0 }
  0xd6   : > { %v825_v54 = vmax.f32 %v793_v48, 0.0  ;;  %v833_v55 = vmax.f32 %v801_v49, 0.0 }
  0xd8   : > { %v1186_v56 = vpack.c.bf16 %v825_v54, %v824_v52  ;;  %v1206_v57 = vpack.c.bf16 %v833_v55, %v832_v53  ;;  %v621_v58 = vpop.f32.mrf.mxu2  ;;  %v641_v59 = vpop.f32.mrf.mxu3 }
  0xd9   : > { %v773_v62 = vmul.f32 %v1441_v26, %v621_v58  ;;  %v781_v63 = vmul.f32 %v1441_v26, %v641_v59  ;;  %v584_v0 = vpop.f32.mrf.mxu0  ;;  %v604_v1 = vpop.f32.mrf.mxu1 }
  0xda   : > { %1254 = vst [vmem:[%s1463_s23 + $0x10] sm:$0xff] %v1186_v56   ;;  %v758_v8 = vmul.f32 %v1441_v26, %v584_v0  ;;  %v766_v9 = vmul.f32 %v1441_v26, %v604_v1 }
  0xdb   : > { %1258 = vst [vmem:[%s1463_s23 + $0x30] sm:$0xff] %v1206_v57   ;;  %v809_v2 = vadd.f32 %v1447_v28, %v773_v62  ;;  %v817_v3 = vadd.f32 %v1447_v28, %v781_v63 }
  0xdc   : > { %v794_v16 = vadd.f32 %v1447_v28, %v758_v8  ;;  %v802_v17 = vadd.f32 %v1447_v28, %v766_v9 }
  0xdd   : > { %v841_v6 = vmax.f32 %v809_v2, 0.0  ;;  %v849_v7 = vmax.f32 %v817_v3, 0.0 }
  0xde   : > { %v826_v24 = vmax.f32 %v794_v16, 0.0  ;;  %v834_v25 = vmax.f32 %v802_v17, 0.0 }
  0xdf   : > { %v1226_v10 = vpack.c.bf16 %v841_v6, %v840_v4  ;;  %v1246_v11 = vpack.c.bf16 %v849_v7, %v848_v5 }
  0xe0   : > { %v624_v12 = vpop.f32.mrf.mxu2  ;;  %v644_v13 = vpop.f32.mrf.mxu3 }
  0xe1   : > { %1262 = vst [vmem:[%s1463_s23 + $0x50] sm:$0xff] %v1226_v10   ;;  %v586_v14 = vpop.f32.mrf.mxu0  ;;  %v606_v15 = vpop.f32.mrf.mxu1  ;;  %v774_v22 = vmul.f32 %v1441_v26, %v624_v12  ;;  %v782_v23 = vmul.f32 %v1441_v26, %v644_v13 }
  0xe2   : > { %1266 = vst [vmem:[%s1463_s23 + $0x70] sm:$0xff] %v1246_v11   ;;  %v759_v18 = vmul.f32 %v1441_v26, %v586_v14  ;;  %v767_v19 = vmul.f32 %v1441_v26, %v606_v15 }
  0xe3   : > { %v810_v34 = vadd.f32 %v1447_v28, %v774_v22  ;;  %v818_v35 = vadd.f32 %v1447_v28, %v782_v23 }
  0xe4   : > { %v795_v20 = vadd.f32 %v1447_v28, %v759_v18  ;;  %v803_v21 = vadd.f32 %v1447_v28, %v767_v19 }
  0xe5   : > { %v842_v40 = vmax.f32 %v810_v34, 0.0  ;;  %v850_v41 = vmax.f32 %v818_v35, 0.0 }
  0xe6   : > { %v827_v27 = vmax.f32 %v795_v20, 0.0  ;;  %v835_v29 = vmax.f32 %v803_v21, 0.0 }
  0xe8   : > { %v1191_v30 = vpack.c.bf16 %v827_v27, %v826_v24  ;;  %v1211_v31 = vpack.c.bf16 %v835_v29, %v834_v25  ;;  %v626_v32 = vpop.f32.mrf.mxu2  ;;  %v646_v33 = vpop.f32.mrf.mxu3 }
  0xe9   : > { %v775_v36 = vmul.f32 %v1441_v26, %v626_v32  ;;  %v783_v37 = vmul.f32 %v1441_v26, %v646_v33 }
  0xea   : > { %1255 = vst [vmem:[%s1463_s23 + $0x18] sm:$0xff] %v1191_v30  }
  0xeb   : > { %1259 = vst [vmem:[%s1463_s23 + $0x38] sm:$0xff] %v1211_v31   ;;  %v811_v38 = vadd.f32 %v1447_v28, %v775_v36  ;;  %v819_v39 = vadd.f32 %v1447_v28, %v783_v37 }
  0xed   : > { %v843_v42 = vmax.f32 %v811_v38, 0.0  ;;  %v851_v43 = vmax.f32 %v819_v39, 0.0 }
  0xef   : > { %v1231_v44 = vpack.c.bf16 %v843_v42, %v842_v40  ;;  %v1251_v45 = vpack.c.bf16 %v851_v43, %v850_v41 }
  0xf1   : > { %1263 = vst [vmem:[%s1463_s23 + $0x58] sm:$0xff] %v1231_v44  }
  0xf2   : > { %1267 = vst [vmem:[%s1463_s23 + $0x78] sm:$0xff] %v1251_v45  }
  0xf3 PF: > { %s14_s17 = sadd.s32 1, %s1340_s17   ;;  %s1549_s15 = smov %s1336_s16 }
  0xf4   : > { %p11_p5 = scmp.ge.s32.totalorder %s14_s17, 4   ;;  %s1550_s16 = smov %s1552_s18 }
  0xf6   :  { %13 = sbr.rel (!%p11_p5) target bundleno = 2 (0x2), region = 83 }

// kernel: encoder_bottleneck_forward.4
= control target key start
LH: loop header
LB: loop body
LE: loop exit
PB: predicated region body
PF: predicated region fallthrough
CT: control target
= control target key end

     0   :  { %s613_s1 = inlined_call_operand.vmem [shape: bf16[128,128], index: 1, kind: input, shape index: {}]   ;;  %s614_s2 = inlined_call_operand.vmem [shape: f32[1,128], index: 2, kind: input, shape index: {}]   ;;  %s615_s3 = inlined_call_operand.vmem [shape: f32[1,128], index: 3, kind: input, shape index: {}]   ;;  %s616_s0 = inlined_call_operand.vmem [shape: bf16[128,128], index: 0, kind: input, shape index: {}]   ;;  %s617_s4 = inlined_call_operand.vmem [shape: bf16[128,128], index: 4, kind: output, shape index: {}]  }
   0x1   :  { %v436_v0 = vld [vmem:[%s613_s1 + $0x38] sm:$0xff]  ;;  %v435_v1 = vld [vmem:[%s613_s1 + $0x30] sm:$0xff]  ;;  %v434_v2 = vld [vmem:[%s613_s1 + $0x28] sm:$0xff] }
   0x2   :  { %181 = vmatpush.bf16.msra.mxu0 %v436_v0  ;;  %484 = vmatpush.bf16.msra.mxu1 %v436_v0  ;;  %v433_v3 = vld [vmem:[%s613_s1 + $0x20] sm:$0xff]  ;;  %v432_v4 = vld [vmem:[%s613_s1 + $0x18] sm:$0xff]  ;;  %v431_v5 = vld [vmem:[%s613_s1 + $0x10] sm:$0xff] }
   0x3   :  { %485 = vmatpush.bf16.msra.mxu2 %v436_v0  ;;  %486 = vmatpush.bf16.msra.mxu3 %v436_v0  ;;  %v430_v6 = vld [vmem:[%s613_s1 + $0x8] sm:$0xff]  ;;  %v429_v7 = vld [vmem:[%s613_s1] sm:$0xff]  ;;  %v423_v9 = vld [vmem:[%s616_s0 + $0x10] sm:$0xff] }
   0x4   :  { %v421_v8 = vld [vmem:[%s616_s0] sm:$0xff]  ;;  %v427_v11 = vld [vmem:[%s616_s0 + $0x30] sm:$0xff]  ;;  %v422_v12 = vld [vmem:[%s616_s0 + $0x8] sm:$0xff] }
   0x5   :  { %v425_v10 = vld [vmem:[%s616_s0 + $0x20] sm:$0xff]  ;;  %v424_v13 = vld [vmem:[%s616_s0 + $0x18] sm:$0xff]  ;;  %v426_v14 = vld [vmem:[%s616_s0 + $0x28] sm:$0xff] }
   0x6   :  { %182 = vmatpush.bf16.msra.mxu0 %v435_v1  ;;  %487 = vmatpush.bf16.msra.mxu1 %v435_v1  ;;  %v428_v15 = vld [vmem:[%s616_s0 + $0x38] sm:$0xff]  ;;  %v508_v18 = vld [vmem:[%s614_s2] ss:$0 sm:$0xff] }
   0x7   :  { %488 = vmatpush.bf16.msra.mxu2 %v435_v1  ;;  %489 = vmatpush.bf16.msra.mxu3 %v435_v1  ;;  %v509_v20 = vld [vmem:[%s615_s3] ss:$0 sm:$0xff] }
   0xa   :  { %183 = vmatpush.bf16.msra.mxu0 %v434_v2  ;;  %490 = vmatpush.bf16.msra.mxu1 %v434_v2 }
   0xb   :  { %491 = vmatpush.bf16.msra.mxu2 %v434_v2  ;;  %492 = vmatpush.bf16.msra.mxu3 %v434_v2 }
   0xe   :  { %184 = vmatpush.bf16.msra.mxu0 %v433_v3  ;;  %493 = vmatpush.bf16.msra.mxu1 %v433_v3 }
   0xf   :  { %494 = vmatpush.bf16.msra.mxu2 %v433_v3  ;;  %495 = vmatpush.bf16.msra.mxu3 %v433_v3 }
  0x12   :  { %185 = vmatpush.bf16.msra.mxu0 %v432_v4  ;;  %496 = vmatpush.bf16.msra.mxu1 %v432_v4 }
  0x13   :  { %497 = vmatpush.bf16.msra.mxu2 %v432_v4  ;;  %498 = vmatpush.bf16.msra.mxu3 %v432_v4 }
  0x16   :  { %186 = vmatpush.bf16.msra.mxu0 %v431_v5  ;;  %499 = vmatpush.bf16.msra.mxu1 %v431_v5 }
  0x17   :  { %500 = vmatpush.bf16.msra.mxu2 %v431_v5  ;;  %501 = vmatpush.bf16.msra.mxu3 %v431_v5 }
  0x1a   :  { %187 = vmatpush.bf16.msra.mxu0 %v430_v6  ;;  %502 = vmatpush.bf16.msra.mxu1 %v430_v6 }
  0x1b   :  { %503 = vmatpush.bf16.msra.mxu2 %v430_v6  ;;  %504 = vmatpush.bf16.msra.mxu3 %v430_v6 }
  0x1e   :  { %188 = vmatpush.bf16.msra.mxu0 %v429_v7  ;;  %505 = vmatpush.bf16.msra.mxu1 %v429_v7 }
  0x1f   :  { %506 = vmatpush.bf16.msra.mxu2 %v429_v7  ;;  %507 = vmatpush.bf16.msra.mxu3 %v429_v7 }
  0x21   :  { %189 = vmatmul.bf16.vlgmr.msra.gmra.mxu0 %v421_v8  ;;  %199 = vmatmul.bf16.vlgmr.msra.gmra.mxu1 %v423_v9 }
  0x22   :  { %209 = vmatmul.bf16.vlgmr.msra.gmra.mxu2 %v425_v10  ;;  %219 = vmatmul.bf16.vlgmr.msra.gmra.mxu3 %v427_v11 }
  0x31   :  { %194 = vmatmul.bf16.gmra.mxu0 %v422_v12  ;;  %204 = vmatmul.bf16.gmra.mxu1 %v424_v13 }
  0x32   :  { %214 = vmatmul.bf16.gmra.mxu2 %v426_v14  ;;  %224 = vmatmul.bf16.gmra.mxu3 %v428_v15 }
  0x9e   :  { %v190_v16 = vpop.f32.mrf.mxu0  ;;  %v200_v17 = vpop.f32.mrf.mxu1 }
  0x9f   :  { %v285_v19 = vmul.f32 %v508_v18, %v190_v16  ;;  %v289_v21 = vmul.f32 %v508_v18, %v200_v17 }
  0xa1   :  { %v305_v28 = vadd.f32 %v509_v20, %v285_v19  ;;  %v309_v29 = vadd.f32 %v509_v20, %v289_v21 }
  0xa5   :  { %v210_v22 = vpop.f32.mrf.mxu2  ;;  %v220_v23 = vpop.f32.mrf.mxu3 }
  0xa6   :  { %v192_v24 = vpop.f32.mrf.mxu0  ;;  %v202_v25 = vpop.f32.mrf.mxu1  ;;  %v293_v34 = vmul.f32 %v508_v18, %v210_v22  ;;  %v297_v35 = vmul.f32 %v508_v18, %v220_v23 }
  0xa7   :  { %v286_v26 = vmul.f32 %v508_v18, %v192_v24  ;;  %v290_v27 = vmul.f32 %v508_v18, %v202_v25 }
  0xa8   :  { %v313_v42 = vadd.f32 %v509_v20, %v293_v34  ;;  %v317_v43 = vadd.f32 %v509_v20, %v297_v35 }
  0xa9   :  { %v306_v30 = vadd.f32 %v509_v20, %v286_v26  ;;  %v310_v31 = vadd.f32 %v509_v20, %v290_v27 }
  0xab   :  { %v440_v32 = vpack.c.bf16 %v306_v30, %v305_v28  ;;  %v450_v33 = vpack.c.bf16 %v310_v31, %v309_v29 }
  0xad   :  { %441 = vst [vmem:[%s617_s4] sm:$0xff] %v440_v32   ;;  %v212_v36 = vpop.f32.mrf.mxu2  ;;  %v222_v37 = vpop.f32.mrf.mxu3 }
  0xae   :  { %478 = vst [vmem:[%s617_s4 + $0x10] sm:$0xff] %v450_v33   ;;  %v294_v38 = vmul.f32 %v508_v18, %v212_v36  ;;  %v298_v39 = vmul.f32 %v508_v18, %v222_v37  ;;  %v195_v40 = vpop.f32.mrf.mxu0  ;;  %v205_v41 = vpop.f32.mrf.mxu1 }
  0xaf   :  { %v287_v48 = vmul.f32 %v508_v18, %v195_v40  ;;  %v291_v49 = vmul.f32 %v508_v18, %v205_v41 }
  0xb0   :  { %v314_v44 = vadd.f32 %v509_v20, %v294_v38  ;;  %v318_v45 = vadd.f32 %v509_v20, %v298_v39 }
  0xb1   :  { %v307_v56 = vadd.f32 %v509_v20, %v287_v48  ;;  %v311_v57 = vadd.f32 %v509_v20, %v291_v49 }
  0xb2   :  { %v460_v46 = vpack.c.bf16 %v314_v44, %v313_v42  ;;  %v470_v47 = vpack.c.bf16 %v318_v45, %v317_v43 }
  0xb4   :  { %480 = vst [vmem:[%s617_s4 + $0x20] sm:$0xff] %v460_v46  }
  0xb5   :  { %482 = vst [vmem:[%s617_s4 + $0x30] sm:$0xff] %v470_v47   ;;  %v215_v50 = vpop.f32.mrf.mxu2  ;;  %v225_v51 = vpop.f32.mrf.mxu3 }
  0xb6   :  { %v197_v52 = vpop.f32.mrf.mxu0  ;;  %v207_v53 = vpop.f32.mrf.mxu1  ;;  %v295_v62 = vmul.f32 %v508_v18, %v215_v50  ;;  %v299_v63 = vmul.f32 %v508_v18, %v225_v51 }
  0xb7   :  { %v288_v54 = vmul.f32 %v508_v18, %v197_v52  ;;  %v292_v55 = vmul.f32 %v508_v18, %v207_v53 }
  0xb8   :  { %v315_v4 = vadd.f32 %v509_v20, %v295_v62  ;;  %v319_v5 = vadd.f32 %v509_v20, %v299_v63 }
  0xb9   :  { %v308_v58 = vadd.f32 %v509_v20, %v288_v54  ;;  %v312_v59 = vadd.f32 %v509_v20, %v292_v55 }
  0xbb   :  { %v445_v60 = vpack.c.bf16 %v308_v58, %v307_v56  ;;  %v455_v61 = vpack.c.bf16 %v312_v59, %v311_v57 }
  0xbd   :  { %477 = vst [vmem:[%s617_s4 + $0x8] sm:$0xff] %v445_v60   ;;  %v217_v0 = vpop.f32.mrf.mxu2  ;;  %v227_v1 = vpop.f32.mrf.mxu3 }
  0xbe   :  { %479 = vst [vmem:[%s617_s4 + $0x18] sm:$0xff] %v455_v61   ;;  %v296_v2 = vmul.f32 %v508_v18, %v217_v0  ;;  %v300_v3 = vmul.f32 %v508_v18, %v227_v1 }
  0xc0   :  { %v316_v6 = vadd.f32 %v509_v20, %v296_v2  ;;  %v320_v7 = vadd.f32 %v509_v20, %v300_v3 }
  0xc2   :  { %v465_v8 = vpack.c.bf16 %v316_v6, %v315_v4  ;;  %v475_v9 = vpack.c.bf16 %v320_v7, %v319_v5 }
  0xc4   :  { %481 = vst [vmem:[%s617_s4 + $0x28] sm:$0xff] %v465_v8  }
  0xc5   :  { %483 = vst [vmem:[%s617_s4 + $0x38] sm:$0xff] %v475_v9  }

// kernel: encoder_bottleneck_forward.6
= control target key start
LH: loop header
LB: loop body
LE: loop exit
PB: predicated region body
PF: predicated region fallthrough
CT: control target
= control target key end

     0   :  { %s2160_s15 = smov 0   ;;  %s2590_s0 = inlined_call_operand.vmem [shape: bf16[2,4,9,9,64], index: 0, kind: input, shape index: {}]   ;;  %s2591_s1 = inlined_call_operand.vmem [shape: bf16[9,64,64], index: 1, kind: input, shape index: {}]   ;;  %s2592_s2 = inlined_call_operand.vmem [shape: f32[1,64], index: 2, kind: input, shape index: {}]   ;;  %s2593_s3 = inlined_call_operand.vmem [shape: f32[1,64], index: 3, kind: input, shape index: {}]   ;;  %s2594_s4 = inlined_call_operand.vmem [shape: bf16[2,64,64], index: 4, kind: output, shape index: {}]  }
   0x1 LB: > { %s1621_s16 = sadd.s32 4294967295, %s2133_s15   ;;  %p1625_p0 = scmp.ge.s32.totalorder %s2133_s15, 1  ;;  %s2133_s15 = sphi %s2160_s15, %s14_s15  }
   0x2   : > { %p162_p1 = scmp.lt.s32.totalorder %s2133_s15, 3 }
   0x4   : > { %p163_p2 = pnand %p1625_p0, %p162_p1 }
   0x5   : > { %p188_p3 = scmp.lt.s32.totalorder (!%p163_p2), %s1621_s16, 1 }
   0x6   : > { %166 = sbr.rel (%p163_p2) target bundleno = 310 (0x136), region = 36 }
   0xb   : > { %v2059_v0 = vld [vmem:[%s2591_s1 + $0x38] sm:$0xff]  ;;  %v2058_v1 = vld [vmem:[%s2591_s1 + $0x30] sm:$0xff]  ;;  %s2598_s16 = smov (!%p188_p3, %s1621_s16), 1  ;;  %v2057_v2 = vld [vmem:[%s2591_s1 + $0x28] sm:$0xff]  ;;  %vm277_vm0 = vcmask 523264   ;;  %vm1557_vm4 = vcmask 519168  }
   0xc   : > { %2104 = vmatpush.bf16.msra.mxu1 %v2059_v0  ;;  %2105 = vmatpush.bf16.msra.mxu2 %v2059_v0  ;;  %s2116_s21 = smul.u32 288, %s2598_s16  ;;  %v2056_v4 = vld [vmem:[%s2591_s1 + $0x20] sm:$0xff]  ;;  %v2063_v20 = vld [vmem:[%s2591_s1 + $0x58] sm:$0xff]  ;;  %v2062_v35 = vld [vmem:[%s2591_s1 + $0x50] sm:$0xff]  ;;  %vm420_vm1 = vsmask.f32 3328 }
   0xd   : > { %2106 = vmatpush.bf16.msra.mxu3 %v2059_v0  ;;  %294 = vmatpush.bf16.msra.mxu0 %v2059_v0  ;;  %v2051_v21 = vld [vmem:[%s2591_s1 + $0x18] sm:$0xff]  ;;  %v2050_v36 = vld [vmem:[%s2591_s1 + $0x10] sm:$0xff]  ;;  %vm421_vm2 = vsmask.f32 7440  ;;  %v2061_v47 = vld [vmem:[%s2591_s1 + $0x48] sm:$0xff]  ;;  %s2043_s27 = sshll.u32 %s2598_s16, 5 }
   0xe   : > { %s2183_s26 = scalar_lea.vmem %s2590_s0, %s2116_s21  ;;  %v2071_v32 = vld [vmem:[%s2591_s1 + $0x78] sm:$0xff]  ;;  %v2070_v38 = vld [vmem:[%s2591_s1 + $0x70] sm:$0xff]  ;;  %vm2231_vm3 = vmor %vm420_vm1, %vm421_vm2  ;;  %s2533_s30 = scalar_lea.vmem %s2594_s4, %s2043_s27 }
   0xf   : > { %v1651_v3 = vld [vmem:[%s2183_s26 + $0x58] sm:$0xf]  ;;  %v2053_v5 = vld [vmem:[%s2183_s26 + $0x5c] sm:$0xf0]  ;;  %v1655_v6 = vld [vmem:[%s2183_s26 + $0x68] sm:$0xf] }
  0x10   : > { %2107 = vmatpush.bf16.msra.mxu1 %v2058_v1  ;;  %2108 = vmatpush.bf16.msra.mxu2 %v2058_v1  ;;  %v2054_v7 = vld [vmem:[%s2183_s26 + $0x6c] sm:$0xf0]  ;;  %v1659_v8 = vld [vmem:[%s2183_s26 + $0x78] sm:$0xf]  ;;  %v2055_v9 = vld [vmem:[%s2183_s26 + $0x7c] sm:$0xf0]  ;;  %v1652_v18 = vor.u32 %v2053_v5, %v1651_v3 }
  0x11   : > { %2109 = vmatpush.bf16.msra.mxu3 %v2058_v1  ;;  %295 = vmatpush.bf16.msra.mxu0 %v2058_v1  ;;  %v1647_v10 = vld [vmem:[%s2183_s26 + $0x48] sm:$0xf]  ;;  %v2052_v11 = vld [vmem:[%s2183_s26 + $0x4c] sm:$0xf0]  ;;  %v404_v12 = vld [vmem:[%s2183_s26] sm:$0xf]  ;;  %v1656_v19 = vor.u32 %v2054_v7, %v1655_v6  ;;  %v1660_v24 = vor.u32 %v2055_v9, %v1659_v8 }
  0x12   : > { %v405_v13 = vld [vmem:[%s2183_s26 + $0x4] sm:$0x1]  ;;  %v406_v14 = vld [vmem:[%s2183_s26 + $0x8] sm:$0xf]  ;;  %v407_v15 = vld [vmem:[%s2183_s26 + $0xc] sm:$0x1]  ;;  %v1648_v25 = vor.u32 %v2052_v11, %v1647_v10 }
  0x13   : > { %v424_v16 = vshrl.u32 %v404_v12, 16  ;;  %v427_v17 = vshll.u32 %v404_v12, 16  ;;  %v438_v22 = vshrl.u32 %v406_v14, 16  ;;  %v441_v23 = vshll.u32 %v406_v14, 16  ;;  %v2079_v33 = vld [vmem:[%s2591_s1 + $0x98] sm:$0xff]  ;;  %v2078_v44 = vld [vmem:[%s2591_s1 + $0x90] sm:$0xff] }
  0x14   : > { %2110 = vmatpush.bf16.msra.mxu1 %v2057_v2  ;;  %2111 = vmatpush.bf16.msra.mxu2 %v2057_v2  ;;  %v433_v28 = vshll.u32 %v405_v13, 16  ;;  %v447_v31 = vshll.u32 %v407_v15, 16  ;;  %v408_v43 = vld [vmem:[%s2183_s26 + $0x10] sm:$0xf]  ;;  %v410_v46 = vld [vmem:[%s2183_s26 + $0x18] sm:$0xf] }
  0x15   : > { %2112 = vmatpush.bf16.msra.mxu3 %v2057_v2  ;;  %296 = vmatpush.bf16.msra.mxu0 %v2057_v2  ;;  %v426_v26 = vrot.slane %v424_v16, 4  ;;  %v429_v27 = vrot.slane %v427_v17, 5  ;;  %v440_v29 = vrot.slane %v438_v22, 4  ;;  %v443_v30 = vrot.slane %v441_v23, 5  ;;  %v2049_v48 = vld [vmem:[%s2591_s1 + $0x8] sm:$0xff]  ;;  %v2060_v53 = vld [vmem:[%s2591_s1 + $0x40] sm:$0xff] }
  0x16   : > { %v435_v40 = vrot.slane %v433_v28, 5  ;;  %v449_v42 = vrot.slane %v447_v31, 5  ;;  %v452_v49 = vshrl.u32 %v408_v43, 16  ;;  %v455_v50 = vshll.u32 %v408_v43, 16  ;;  %v2069_v51 = vld [vmem:[%s2591_s1 + $0x68] sm:$0xff]  ;;  %v2048_v58 = vld [vmem:[%s2591_s1] sm:$0xff] }
  0x17   : > { %v430_v34 = vor.u32 %v429_v27, %v426_v26  ;;  %v444_v37 = vor.u32 %v443_v30, %v440_v29  ;;  %v2077_v52 = vld [vmem:[%s2591_s1 + $0x88] sm:$0xff]  ;;  %v466_v56 = vshrl.u32 %v410_v46, 16  ;;  %v469_v57 = vshll.u32 %v410_v46, 16  ;;  %v1683_v59 = vld [vmem:[%s2183_s26] sm:$0xf]  ;;  %v2091_v63 = vld [vmem:[%s2591_s1 + $0xd8] sm:$0xff] }
  0x18   : > { %2113 = vmatpush.bf16.msra.mxu1 %v2056_v4  ;;  %2114 = vmatpush.bf16.msra.mxu2 %v2056_v4  ;;  %v2044_v60 = vld [vmem:[%s2183_s26 + $0x4] sm:$0xf0]  ;;  %v1763_v61 = vld [vmem:[%s2183_s26 + $0x90] sm:$0xf]  ;;  %v2064_v62 = vld [vmem:[%s2183_s26 + $0x94] sm:$0xf0] }
  0x19   : > { %2115 = vmatpush.bf16.msra.mxu3 %v2056_v4  ;;  %297 = vmatpush.bf16.msra.mxu0 %v2056_v4  ;;  %v431_v39 = vrot.slane %v430_v34, 4  ;;  %v445_v41 = vrot.slane %v444_v37, 4  ;;  %v1815_v0 = vld [vmem:[%s2183_s26 + $0xd8] sm:$0xf]  ;;  %v2068_v1 = vld [vmem:[%s2591_s1 + $0x60] sm:$0xff]  ;;  %v454_v6 = vrot.slane %v452_v49, 4  ;;  %v1684_v13 = vor.u32 %v2044_v60, %v1683_v59 }
  0x1a   : > { %v2072_v4 = vld [vmem:[%s2183_s26 + $0xdc] sm:$0xf0]  ;;  %v2083_v5 = vld [vmem:[%s2591_s1 + $0xb8] sm:$0xff]  ;;  %v457_v7 = vrot.slane %v455_v50, 5  ;;  %v468_v8 = vrot.slane %v466_v56, 4  ;;  %v471_v9 = vrot.slane %v469_v57, 5  ;;  %v1764_v17 = vor.u32 %v2064_v62, %v1763_v61 }
  0x1b   : > { %1678 = vmatmul.msk.bf16.vlgmr.msra.gmra.mxu1 %vm277_vm0, %v1652_v18  ;;  %1679 = vmatmul.msk.bf16.vlgmr.msra.gmra.mxu2 %vm277_vm0, %v1656_v19  ;;  %v436_v54 = vsel %vm2231_vm3, %v431_v39, %v435_v40  ;;  %v450_v55 = vsel %vm2231_vm3, %v445_v41, %v449_v42  ;;  %v2076_v10 = vld [vmem:[%s2591_s1 + $0x80] sm:$0xff]  ;;  %v409_v11 = vld [vmem:[%s2183_s26 + $0x14] sm:$0x1]  ;;  %v411_v12 = vld [vmem:[%s2183_s26 + $0x1c] sm:$0x1]  ;;  %v1816_v18 = vor.u32 %v2072_v4, %v1815_v0 }
  0x1c   : > { %596 = vmatpush.bf16.msrb.mxu2 %v2063_v20  ;;  %379 = vmatpush.bf16.msrb.mxu1 %v2051_v21  ;;  %v544_v2 = vunpack.c.l.b16 %v436_v54  ;;  %v545_v3 = vunpack.c.l.b16 %v450_v55  ;;  %v2099_v14 = vld [vmem:[%s2591_s1 + $0xf8] sm:$0xff]  ;;  %v458_v19 = vor.u32 %v457_v7, %v454_v6  ;;  %v461_v20 = vshll.u32 %v409_v11, 16  ;;  %v2090_v23 = vld [vmem:[%s2591_s1 + $0xd0] sm:$0xff]  ;;  %v412_v31 = vld [vmem:[%s2183_s26 + $0x20] sm:$0xf] }
  0x1d   : > { %1680 = vmatmul.msk.bf16.vlgmr.msra.gmra.mxu3 %vm277_vm0, %v1660_v24  ;;  %1677 = vmatmul.msk.bf16.vlgmr.msra.gmra.mxu0 %vm277_vm0, %v1648_v25  ;;  %v2103_v15 = vld [vmem:[%s2591_s1 + $0x118] sm:$0xff]  ;;  %v472_v21 = vor.u32 %v471_v9, %v468_v8  ;;  %v475_v22 = vshll.u32 %v411_v12, 16  ;;  %v2082_v24 = vld [vmem:[%s2591_s1 + $0xb0] sm:$0xff]  ;;  %v2081_v34 = vld [vmem:[%s2591_s1 + $0xa8] sm:$0xff]  ;;  %v480_v37 = vshrl.u32 %v412_v31, 16 }
  0x1e   : > { %707 = vmatpush.bf16.msrb.mxu3 %v2071_v32  ;;  %818 = vmatpush.bf16.msrb.mxu0 %v2079_v33  ;;  %v552_v16 = vpack.c.b16 %v545_v3, %v544_v2  ;;  %v2098_v25 = vld [vmem:[%s2591_s1 + $0xf0] sm:$0xff]  ;;  %v459_v27 = vrot.slane %v458_v19, 4  ;;  %v463_v28 = vrot.slane %v461_v20, 5  ;;  %v414_v32 = vld [vmem:[%s2183_s26 + $0x28] sm:$0xf]  ;;  %v2088_v8 = vld [vmem:[%s2591_s1 + $0xc0] sm:$0xff] }
  0x1f   : > { %v2102_v26 = vld [vmem:[%s2591_s1 + $0x110] sm:$0xff]  ;;  %v473_v29 = vrot.slane %v472_v21, 4  ;;  %v477_v30 = vrot.slane %v475_v22, 5  ;;  %v2089_v33 = vld [vmem:[%s2591_s1 + $0xc8] sm:$0xff]  ;;  %v494_v41 = vshrl.u32 %v414_v32, 16  ;;  %v497_v42 = vshll.u32 %v414_v32, 16 }
  0x20   : > { %597 = vmatpush.bf16.msrb.mxu2 %v2062_v35  ;;  %380 = vmatpush.bf16.msrb.mxu1 %v2050_v36  ;;  %v2097_v35 = vld [vmem:[%s2591_s1 + $0xe8] sm:$0xff]  ;;  %v464_v39 = vsel %vm2231_vm3, %v459_v27, %v463_v28  ;;  %v1687_v43 = vld [vmem:[%s2183_s26 + $0x10] sm:$0xf]  ;;  %v413_v50 = vld [vmem:[%s2183_s26 + $0x24] sm:$0x1] }
  0x21   : > { %v2101_v36 = vld [vmem:[%s2591_s1 + $0x108] sm:$0xff]  ;;  %v478_v40 = vsel %vm2231_vm3, %v473_v29, %v477_v30  ;;  %v546_v46 = vunpack.c.l.b16 %v464_v39  ;;  %v499_v54 = vrot.slane %v497_v42, 5  ;;  %v2073_v56 = vld [vmem:[%s2183_s26 + $0xec] sm:$0xf0]  ;;  %v489_v61 = vshll.u32 %v413_v50, 16  ;;  %v2096_v9 = vld [vmem:[%s2591_s1 + $0xe0] sm:$0xff] }
  0x22   : > { %708 = vmatpush.bf16.msrb.mxu3 %v2070_v38  ;;  %819 = vmatpush.bf16.msrb.mxu0 %v2078_v44  ;;  %v483_v38 = vshll.u32 %v412_v31, 16  ;;  %v2045_v44 = vld [vmem:[%s2183_s26 + $0x14] sm:$0xf0]  ;;  %v2065_v49 = vld [vmem:[%s2183_s26 + $0xa4] sm:$0xf0] }
  0x23   : > { %v1819_v55 = vld [vmem:[%s2183_s26 + $0xe8] sm:$0xf]  ;;  %v415_v57 = vld [vmem:[%s2183_s26 + $0x2c] sm:$0x1]  ;;  %v416_v2 = vld [vmem:[%s2183_s26 + $0x30] sm:$0xf] }
  0x24   : > { %598 = vmatpush.bf16.msrb.mxu2 %v2061_v47  ;;  %381 = vmatpush.bf16.msrb.mxu1 %v2049_v48  ;;  %v547_v47 = vunpack.c.l.b16 %v478_v40  ;;  %v1767_v48 = vld [vmem:[%s2183_s26 + $0xa0] sm:$0xf]  ;;  %v1820_v62 = vor.u32 %v2073_v56, %v1819_v55  ;;  %v418_v3 = vld [vmem:[%s2183_s26 + $0x38] sm:$0xf]  ;;  %v491_v4 = vrot.slane %v489_v61, 5  ;;  %v508_v11 = vshrl.u32 %v416_v2, 16 }
  0x25   : > { %v1768_v60 = vor.u32 %v2065_v49, %v1767_v48  ;;  %v511_v12 = vshll.u32 %v416_v2, 16  ;;  %v417_v22 = vld [vmem:[%s2183_s26 + $0x34] sm:$0x1]  ;;  %v2046_v27 = vld [vmem:[%s2183_s26 + $0x24] sm:$0xf0] }
  0x26   : > { %709 = vmatpush.bf16.msrb.mxu3 %v2069_v51  ;;  %820 = vmatpush.bf16.msrb.mxu0 %v2077_v52  ;;  %v482_v51 = vrot.slane %v480_v37, 4  ;;  %v485_v52 = vrot.slane %v483_v38, 5  ;;  %v553_v59 = vpack.c.b16 %v547_v47, %v546_v46  ;;  %v1771_v28 = vld [vmem:[%s2183_s26 + $0xb0] sm:$0xf]  ;;  %v2066_v29 = vld [vmem:[%s2183_s26 + $0xb4] sm:$0xf0] }
  0x27   : > { %v513_v19 = vrot.slane %v511_v12, 5  ;;  %v1823_v30 = vld [vmem:[%s2183_s26 + $0xf8] sm:$0xf]  ;;  %v2074_v31 = vld [vmem:[%s2183_s26 + $0xfc] sm:$0xf0]  ;;  %v1772_v38 = vor.u32 %v2066_v29, %v1771_v28 }
  0x28   : > { %599 = vmatpush.bf16.msrb.mxu2 %v2060_v53  ;;  %382 = vmatpush.bf16.msrb.mxu1 %v2048_v58  ;;  %v496_v53 = vrot.slane %v494_v41, 4  ;;  %v1688_v58 = vor.u32 %v2045_v44, %v1687_v43  ;;  %v1824_v39 = vor.u32 %v2074_v31, %v1823_v30  ;;  %v1849_v44 = vld [vmem:[%s2183_s26 + $0x90] sm:$0xf]  ;;  %v1851_v46 = vld [vmem:[%s2183_s26 + $0x98] sm:$0xf] }
  0x29   : > { %v1997_v47 = vld [vmem:[%s2183_s26 + $0x8] sm:$0xf]  ;;  %v1999_v48 = vld [vmem:[%s2183_s26 + $0x10] sm:$0xf] }
  0x2a   : > { %710 = vmatpush.bf16.msrb.mxu3 %v2068_v1  ;;  %821 = vmatpush.bf16.msrb.mxu0 %v2076_v10  ;;  %v500_v0 = vor.u32 %v499_v54, %v496_v53  ;;  %v503_v1 = vshll.u32 %v415_v57, 16  ;;  %v2080_v10 = vld [vmem:[%s2591_s1 + $0xa0] sm:$0xff]  ;;  %v882_v53 = vshrl.u32 %v1851_v46, 16  ;;  %v885_v54 = vshll.u32 %v1851_v46, 16  ;;  %v1855_v28 = vld [vmem:[%s2183_s26 + $0xa8] sm:$0xf] }
  0x2b   : > { %1713 = vmatmul.msk.bf16.vlgmr.msrb.gmra.mxu1 %vm277_vm0, %v1684_v13  ;;  %1741 = vmatmul.msk.bf16.vlgmr.msrb.gmra.mxu2 %vm277_vm0, %v552_v16  ;;  %v522_v13 = vshrl.u32 %v418_v3, 16  ;;  %v1312_v55 = vshrl.u32 %v1997_v47, 16  ;;  %v1315_v56 = vshll.u32 %v1997_v47, 16  ;;  %v1326_v57 = vshrl.u32 %v1999_v48, 16 }
  0x2c   : > { %1151 = vmatpush.bf16.msra.mxu2 %v2091_v63  ;;  %1040 = vmatpush.bf16.msra.mxu1 %v2083_v5  ;;  %v486_v63 = vor.u32 %v485_v52, %v482_v51  ;;  %v501_v6 = vrot.slane %v500_v0, 4  ;;  %v505_v7 = vrot.slane %v503_v1, 5  ;;  %v868_v51 = vshrl.u32 %v1849_v44, 16 }
  0x2d   : > { %1793 = vmatmul.msk.bf16.vlgmr.msrb.gmra.mxu3 %vm277_vm0, %v1764_v17  ;;  %1845 = vmatmul.msk.bf16.vlgmr.msrb.gmra.mxu0 %vm277_vm0, %v1816_v18  ;;  %v510_v18 = vrot.slane %v508_v11, 4  ;;  %v524_v20 = vrot.slane %v522_v13, 4  ;;  %v871_v52 = vshll.u32 %v1849_v44, 16  ;;  %v884_v2 = vrot.slane %v882_v53, 4  ;;  %v2000_v11 = vld [vmem:[%s2183_s26 + $0x14] sm:$0x1] }
  0x2e   : > { %1262 = vmatpush.bf16.msra.mxu3 %v2099_v14  ;;  %1484 = vmatpush.bf16.msra.mxu0 %v2103_v15  ;;  %v487_v5 = vrot.slane %v486_v63, 4  ;;  %v525_v14 = vshll.u32 %v418_v3, 16  ;;  %v2100_v15 = vld [vmem:[%s2591_s1 + $0x100] sm:$0xff]  ;;  %v506_v17 = vsel %vm2231_vm3, %v501_v6, %v505_v7  ;;  %v1850_v63 = vld [vmem:[%s2183_s26 + $0x94] sm:$0x1]  ;;  %v870_v0 = vrot.slane %v868_v51, 4 }
  0x2f   : > { %v514_v32 = vor.u32 %v513_v19, %v510_v18  ;;  %v873_v1 = vrot.slane %v871_v52, 5  ;;  %v887_v3 = vrot.slane %v885_v54, 5  ;;  %v1317_v6 = vrot.slane %v1315_v56, 5  ;;  %v1856_v53 = vld [vmem:[%s2183_s26 + $0xac] sm:$0x1] }
  0x30   : > { %1152 = vmatpush.bf16.msra.mxu2 %v2090_v23  ;;  %1041 = vmatpush.bf16.msra.mxu1 %v2082_v24  ;;  %v492_v16 = vsel %vm2231_vm3, %v487_v5, %v491_v4  ;;  %v527_v21 = vrot.slane %v525_v14, 5  ;;  %v419_v23 = vld [vmem:[%s2183_s26 + $0x3c] sm:$0x1]  ;;  %v1691_v24 = vld [vmem:[%s2183_s26 + $0x20] sm:$0xf]  ;;  %v1314_v5 = vrot.slane %v1312_v55, 4 }
  0x31   : > { %v515_v40 = vrot.slane %v514_v32, 4  ;;  %v1852_v4 = vld [vmem:[%s2183_s26 + $0x9c] sm:$0x1]  ;;  %v1328_v7 = vrot.slane %v1326_v57, 4  ;;  %v2067_v14 = vld [vmem:[%s2183_s26 + $0xc4] sm:$0xf0]  ;;  %v888_v19 = vor.u32 %v887_v3, %v884_v2 }
  0x32   : > { %1263 = vmatpush.bf16.msra.mxu3 %v2098_v25  ;;  %1485 = vmatpush.bf16.msra.mxu0 %v2102_v26  ;;  %v548_v25 = vunpack.c.l.b16 %v492_v16  ;;  %v549_v26 = vunpack.c.l.b16 %v506_v17  ;;  %v2075_v16 = vld [vmem:[%s2183_s26 + $0x10c] sm:$0xf0]  ;;  %v874_v17 = vor.u32 %v873_v1, %v870_v0  ;;  %v877_v18 = vshll.u32 %v1850_v63, 16  ;;  %v2092_v1 = vld [vmem:[%s2183_s26 + $0x54] sm:$0xf0] }
  0x33   : > { %v889_v31 = vrot.slane %v888_v19, 4  ;;  %v1963_v0 = vld [vmem:[%s2183_s26 + $0x50] sm:$0xf] }
  0x34   : > { %1153 = vmatpush.bf16.msra.mxu2 %v2089_v33  ;;  %1042 = vmatpush.bf16.msra.mxu1 %v2081_v34  ;;  %v517_v33 = vshll.u32 %v417_v22, 16  ;;  %v528_v34 = vor.u32 %v527_v21, %v524_v20  ;;  %v554_v37 = vpack.c.b16 %v549_v26, %v548_v25  ;;  %v891_v20 = vshll.u32 %v1852_v4, 16 }
  0x35   : > { %v1318_v21 = vor.u32 %v1317_v6, %v1314_v5  ;;  %v875_v29 = vrot.slane %v874_v17, 4  ;;  %v879_v30 = vrot.slane %v877_v18, 5  ;;  %v919_v5 = vshll.u32 %v1856_v53, 16 }
  0x36   : > { %1264 = vmatpush.bf16.msra.mxu3 %v2097_v35  ;;  %1486 = vmatpush.bf16.msra.mxu0 %v2101_v36  ;;  %v531_v35 = vshll.u32 %v419_v23, 16  ;;  %v1692_v36 = vor.u32 %v2046_v27, %v1691_v24  ;;  %v519_v41 = vrot.slane %v517_v33, 5  ;;  %v529_v42 = vrot.slane %v528_v34, 4  ;;  %v1853_v27 = vld [vmem:[%s2183_s26 + $0xa0] sm:$0xf] }
  0x37   : > { %v1335_v24 = vshll.u32 %v2000_v11, 16  ;;  %v893_v32 = vrot.slane %v891_v20, 5  ;;  %v1319_v33 = vrot.slane %v1318_v21, 4  ;;  %v2004_v11 = vld [vmem:[%s2183_s26 + $0x24] sm:$0x1]  ;;  %v921_v19 = vrot.slane %v919_v5, 5 }
  0x38   : > { %1154 = vmatpush.bf16.msra.mxu2 %v2088_v8  ;;  %1043 = vmatpush.bf16.msra.mxu1 %v2080_v10  ;;  %v533_v43 = vrot.slane %v531_v35, 5  ;;  %v520_v49 = vsel %vm2231_vm3, %v515_v40, %v519_v41  ;;  %v1998_v10 = vld [vmem:[%s2183_s26 + $0xc] sm:$0x1]  ;;  %v913_v40 = vshll.u32 %v1855_v28, 16  ;;  %v2001_v41 = vld [vmem:[%s2183_s26 + $0x18] sm:$0xf] }
  0x39   : > { %v550_v61 = vunpack.c.l.b16 %v520_v49  ;;  %v1321_v22 = vshll.u32 %v1998_v10, 16  ;;  %v894_v44 = vsel %vm2231_vm3, %v889_v31, %v893_v32  ;;  %v1340_v54 = vshrl.u32 %v2001_v41, 16  ;;  %v2002_v10 = vld [vmem:[%s2183_s26 + $0x1c] sm:$0x1] }
  0x3a   : > { %1265 = vmatpush.bf16.msra.mxu3 %v2096_v9  ;;  %1487 = vmatpush.bf16.msra.mxu0 %v2100_v15  ;;  %v534_v50 = vsel %vm2231_vm3, %v529_v42, %v533_v43  ;;  %v1775_v9 = vld [vmem:[%s2183_s26 + $0xc0] sm:$0xf]  ;;  %v1827_v15 = vld [vmem:[%s2183_s26 + $0x108] sm:$0xf]  ;;  %v880_v43 = vsel %vm2231_vm3, %v875_v29, %v879_v30  ;;  %v915_v52 = vrot.slane %v913_v40, 5  ;;  %v1343_v55 = vshll.u32 %v2001_v41, 16 }
  0x3b   : > { %1714 = vmatmul.msk.bf16.gmra.mxu1 %vm277_vm0, %v1688_v58  ;;  %1742 = vmatmul.msk.bf16.gmra.mxu2 %vm277_vm0, %v553_v59  ;;  %v1329_v58 = vshll.u32 %v1999_v48, 16  ;;  %v1695_v59 = vld [vmem:[%s2183_s26 + $0x30] sm:$0xf]  ;;  %v1776_v25 = vor.u32 %v2067_v14, %v1775_v9  ;;  %v1828_v26 = vor.u32 %v2075_v16, %v1827_v15  ;;  %v1323_v34 = vrot.slane %v1321_v22, 5  ;;  %v2003_v42 = vld [vmem:[%s2183_s26 + $0x20] sm:$0xf] }
  0x3c   : > { %v1854_v48 = vld [vmem:[%s2183_s26 + $0xa4] sm:$0x1]  ;;  %v1354_v56 = vshrl.u32 %v2003_v42, 16  ;;  %v1357_v57 = vshll.u32 %v2003_v42, 16  ;;  %v1342_v6 = vrot.slane %v1340_v54, 4  ;;  %v1964_v14 = vor.u32 %v2092_v1, %v1963_v0 }
  0x3d   : > { %1794 = vmatmul.msk.bf16.gmra.mxu3 %vm277_vm0, %v1768_v60  ;;  %1846 = vmatmul.msk.bf16.gmra.mxu0 %vm277_vm0, %v1820_v62  ;;  %v2047_v60 = vld [vmem:[%s2183_s26 + $0x34] sm:$0xf0]  ;;  %v551_v62 = vunpack.c.l.b16 %v534_v50  ;;  %v1331_v8 = vrot.slane %v1329_v58, 5  ;;  %v1324_v46 = vsel %vm2231_vm3, %v1319_v33, %v1323_v34  ;;  %v988_v58 = vunpack.c.l.b16 %v880_v43  ;;  %v2007_v29 = vld [vmem:[%s2183_s26 + $0x30] sm:$0xf] }
  0x3e   : > { %v1696_v12 = vor.u32 %v2047_v60, %v1695_v59  ;;  %v989_v59 = vunpack.c.l.b16 %v894_v44  ;;  %v1911_v60 = vld [vmem:[%s2183_s26 + $0x8] sm:$0xf]  ;;  %v905_v3 = vshll.u32 %v1854_v48, 16  ;;  %v1359_v9 = vrot.slane %v1357_v57, 5  ;;  %v1915_v44 = vld [vmem:[%s2183_s26 + $0x18] sm:$0xf] }
  0x3f   : > { %v555_v13 = vpack.c.b16 %v551_v62, %v550_v61  ;;  %v1332_v23 = vor.u32 %v1331_v8, %v1328_v7  ;;  %v2084_v61 = vld [vmem:[%s2183_s26 + $0xc] sm:$0xf0]  ;;  %v1432_v62 = vunpack.c.l.b16 %v1324_v46  ;;  %v1345_v7 = vrot.slane %v1343_v55, 5  ;;  %v2085_v46 = vld [vmem:[%s2183_s26 + $0x1c] sm:$0xf0] }
  0x40   : > { %v1356_v8 = vrot.slane %v1354_v56, 4  ;;  %v907_v17 = vrot.slane %v905_v3, 5  ;;  %v1349_v21 = vshll.u32 %v2002_v10, 16  ;;  %v1382_v40 = vshrl.u32 %v2007_v29, 16  ;;  %v1860_v54 = vld [vmem:[%s2183_s26 + $0xbc] sm:$0x1] }
  0x41   : > { %v1333_v35 = vrot.slane %v1332_v23, 4  ;;  %v1346_v20 = vor.u32 %v1345_v7, %v1342_v6  ;;  %v1363_v23 = vshll.u32 %v2004_v11, 16  ;;  %v1385_v41 = vshll.u32 %v2007_v29, 16  ;;  %v1967_v1 = vld [vmem:[%s2183_s26 + $0x60] sm:$0xf] }
  0x42   : > { %v1360_v22 = vor.u32 %v1359_v9, %v1356_v8  ;;  %v1351_v31 = vrot.slane %v1349_v21, 5  ;;  %v1384_v57 = vrot.slane %v1382_v40, 4  ;;  %v1916_v0 = vor.u32 %v2085_v46, %v1915_v44  ;;  %v1861_v21 = vld [vmem:[%s2183_s26 + $0xc0] sm:$0xf]  ;;  %v2086_v40 = vld [vmem:[%s2183_s26 + $0x2c] sm:$0xf0] }
  0x43   : > { %v1347_v30 = vrot.slane %v1346_v20, 4  ;;  %v1365_v33 = vrot.slane %v1363_v23, 5  ;;  %v947_v6 = vshll.u32 %v1860_v54, 16  ;;  %v2009_v23 = vld [vmem:[%s2183_s26 + $0x38] sm:$0xf]  ;;  %v952_v29 = vshrl.u32 %v1861_v21, 16 }
  0x44   : > { %v1361_v32 = vrot.slane %v1360_v22, 4  ;;  %v1863_v22 = vld [vmem:[%s2183_s26 + $0xc8] sm:$0xf]  ;;  %v1862_v46 = vld [vmem:[%s2183_s26 + $0xc4] sm:$0x1] }
  0x46   : > { %v1366_v48 = vsel %vm2231_vm3, %v1361_v32, %v1365_v33  ;;  %v969_v32 = vshll.u32 %v1863_v22, 16  ;;  %v1396_v33 = vshrl.u32 %v2009_v23, 16 }
  0x4b   : > { %1715 = vmatmul.msk.bf16.gmra.mxu1 %vm277_vm0, %v1692_v36  ;;  %1743 = vmatmul.msk.bf16.gmra.mxu2 %vm277_vm0, %v554_v37  ;;  %v1337_v36 = vrot.slane %v1335_v24, 5  ;;  %v896_v37 = vshrl.u32 %v1853_v27, 16  ;;  %v1857_v24 = vld [vmem:[%s2183_s26 + $0xb0] sm:$0xf] }
  0x4c   : > { %v924_v34 = vshrl.u32 %v1857_v24, 16 }
  0x4d   : > { %1795 = vmatmul.msk.bf16.gmra.mxu3 %vm277_vm0, %v1772_v38  ;;  %1847 = vmatmul.msk.bf16.gmra.mxu0 %vm277_vm0, %v1824_v39  ;;  %v899_v38 = vshll.u32 %v1853_v27, 16  ;;  %v910_v39 = vshrl.u32 %v1855_v28, 16  ;;  %v1338_v47 = vsel %vm2231_vm3, %v1333_v35, %v1337_v36  ;;  %v898_v49 = vrot.slane %v896_v37, 4  ;;  %v2005_v28 = vld [vmem:[%s2183_s26 + $0x28] sm:$0xf] }
  0x4e   : > { %v1433_v63 = vunpack.c.l.b16 %v1338_v47  ;;  %v927_v35 = vshll.u32 %v1857_v24, 16  ;;  %v1352_v47 = vsel %vm2231_vm3, %v1347_v30, %v1351_v31  ;;  %v2011_v24 = vld [vmem:[%s2183_s26 + $0x40] sm:$0xf]  ;;  %v955_v30 = vshll.u32 %v1861_v21, 16 }
  0x4f   : > { %v901_v50 = vrot.slane %v899_v38, 5  ;;  %v912_v51 = vrot.slane %v910_v39, 4  ;;  %v1368_v38 = vshrl.u32 %v2005_v28, 16  ;;  %v1371_v39 = vshll.u32 %v2005_v28, 16  ;;  %v2087_v21 = vld [vmem:[%s2183_s26 + $0x3c] sm:$0xf0] }
  0x50   : > { %v1440_v15 = vpack.c.b16 %v1433_v63, %v1432_v62  ;;  %v2008_v62 = vld [vmem:[%s2183_s26 + $0x34] sm:$0x1]  ;;  %v966_v31 = vshrl.u32 %v1863_v22, 16 }
  0x51   : > { %v902_v2 = vor.u32 %v901_v50, %v898_v49  ;;  %v916_v4 = vor.u32 %v915_v52, %v912_v51  ;;  %v1858_v49 = vld [vmem:[%s2183_s26 + $0xb4] sm:$0x1]  ;;  %v926_v50 = vrot.slane %v924_v34, 4  ;;  %v929_v51 = vrot.slane %v927_v35, 5 }
  0x52   : > { %v1370_v55 = vrot.slane %v1368_v38, 4  ;;  %v1373_v56 = vrot.slane %v1371_v39, 5  ;;  %v1391_v10 = vshll.u32 %v2008_v62, 16  ;;  %v1399_v34 = vshll.u32 %v2009_v23, 16 }
  0x53   : > { %v903_v16 = vrot.slane %v902_v2, 4  ;;  %v917_v18 = vrot.slane %v916_v4, 4  ;;  %v2093_v2 = vld [vmem:[%s2183_s26 + $0x64] sm:$0xf0]  ;;  %v930_v3 = vor.u32 %v929_v51, %v926_v50  ;;  %v933_v4 = vshll.u32 %v1858_v49, 16 }
  0x54   : > { %v1374_v7 = vor.u32 %v1373_v56, %v1370_v55  ;;  %v1968_v11 = vor.u32 %v2093_v2, %v1967_v1  ;;  %v1393_v20 = vrot.slane %v1391_v10, 5  ;;  %v1410_v35 = vshrl.u32 %v2011_v24, 16  ;;  %v1864_v51 = vld [vmem:[%s2183_s26 + $0xcc] sm:$0x1]  ;;  %v2010_v56 = vld [vmem:[%s2183_s26 + $0x3c] sm:$0x1] }
  0x55   : > { %v922_v27 = vsel %vm2231_vm3, %v917_v18, %v921_v19  ;;  %v968_v49 = vrot.slane %v966_v31, 4  ;;  %v971_v50 = vrot.slane %v969_v32, 5  ;;  %v975_v1 = vshll.u32 %v1864_v51, 16 }
  0x56   : > { %v991_v43 = vunpack.c.l.b16 %v922_v27  ;;  %v1412_v54 = vrot.slane %v1410_v35, 4 }
  0x5b   : > { %1716 = vmatmul.msk.bf16.gmra.mxu1 %vm277_vm0, %v1696_v12  ;;  %1744 = vmatmul.msk.bf16.gmra.mxu2 %vm277_vm0, %v555_v13  ;;  %v996_v12 = vpack.c.b16 %v989_v59, %v988_v58  ;;  %v1912_v13 = vor.u32 %v2084_v61, %v1911_v60  ;;  %v1387_v58 = vrot.slane %v1385_v41, 5  ;;  %v1434_v59 = vunpack.c.l.b16 %v1352_v47  ;;  %v2006_v61 = vld [vmem:[%s2183_s26 + $0x2c] sm:$0x1]  ;;  %v1971_v41 = vld [vmem:[%s2183_s26 + $0x70] sm:$0xf] }
  0x5c   : > { %v1435_v60 = vunpack.c.l.b16 %v1366_v48  ;;  %v1377_v8 = vshll.u32 %v2006_v61, 16  ;;  %v954_v47 = vrot.slane %v952_v29, 4  ;;  %v957_v48 = vrot.slane %v955_v30, 5 }
  0x5d   : > { %1796 = vmatmul.msk.bf16.gmra.mxu3 %vm277_vm0, %v1776_v25  ;;  %1848 = vmatmul.msk.bf16.gmra.mxu0 %vm277_vm0, %v1828_v26  ;;  %v1859_v25 = vld [vmem:[%s2183_s26 + $0xb8] sm:$0xf]  ;;  %v908_v26 = vsel %vm2231_vm3, %v903_v16, %v907_v17  ;;  %v1388_v9 = vor.u32 %v1387_v58, %v1384_v57  ;;  %v949_v16 = vrot.slane %v947_v6, 5  ;;  %v1375_v17 = vrot.slane %v1374_v7, 4  ;;  %v2012_v57 = vld [vmem:[%s2183_s26 + $0x44] sm:$0x1] }
  0x5e   : > { %v938_v36 = vshrl.u32 %v1859_v25, 16  ;;  %v941_v37 = vshll.u32 %v1859_v25, 16  ;;  %v990_v42 = vunpack.c.l.b16 %v908_v26  ;;  %v1379_v18 = vrot.slane %v1377_v8, 5 }
  0x5f   : > { %v1389_v19 = vrot.slane %v1388_v9, 4  ;;  %v958_v62 = vor.u32 %v957_v48, %v954_v47  ;;  %v977_v9 = vrot.slane %v975_v1, 5 }
  0x60   : > { %v940_v52 = vrot.slane %v938_v36, 4  ;;  %v943_v53 = vrot.slane %v941_v37, 5  ;;  %v997_v63 = vpack.c.b16 %v991_v43, %v990_v42  ;;  %v1380_v27 = vsel %vm2231_vm3, %v1375_v17, %v1379_v18  ;;  %v1919_v37 = vld [vmem:[%s2183_s26 + $0x28] sm:$0xf]  ;;  %v2094_v42 = vld [vmem:[%s2183_s26 + $0x74] sm:$0xf0] }
  0x61   : > { %v1394_v28 = vsel %vm2231_vm3, %v1389_v19, %v1393_v20  ;;  %v1413_v36 = vshll.u32 %v2011_v24, 16  ;;  %v1436_v43 = vunpack.c.l.b16 %v1380_v27  ;;  %v959_v6 = vrot.slane %v958_v62, 4  ;;  %v1923_v20 = vld [vmem:[%s2183_s26 + $0x38] sm:$0xf]  ;;  %v1975_v24 = vld [vmem:[%s2183_s26 + $0x80] sm:$0xf] }
  0x62   : > { %v944_v5 = vor.u32 %v943_v53, %v940_v52  ;;  %v1437_v44 = vunpack.c.l.b16 %v1394_v28  ;;  %v1398_v52 = vrot.slane %v1396_v33, 4  ;;  %v1401_v53 = vrot.slane %v1399_v34, 5 }
  0x63   : > { %v1415_v55 = vrot.slane %v1413_v36, 5  ;;  %v1924_v27 = vor.u32 %v2087_v21, %v1923_v20 }
  0x64   : > { %v1442_v61 = vpack.c.b16 %v1437_v44, %v1436_v43  ;;  %v1402_v2 = vor.u32 %v1401_v53, %v1398_v52 }
  0x66   : > { %v1403_v10 = vrot.slane %v1402_v2, 4 }
  0x6b   : > { %1889 = vmatmul.msk.bf16.vlgmr.msra.gmra.mxu1 %vm277_vm0, %v996_v12  ;;  %1941 = vmatmul.msk.bf16.vlgmr.msra.gmra.mxu2 %vm277_vm0, %v1912_v13  ;;  %v1441_v12 = vpack.c.b16 %v1435_v60, %v1434_v59  ;;  %v931_v13 = vrot.slane %v930_v3, 4  ;;  %v1920_v59 = vor.u32 %v2086_v40, %v1919_v37  ;;  %v1972_v60 = vor.u32 %v2094_v42, %v1971_v41 }
  0x6c   : > { %v1405_v3 = vshll.u32 %v2010_v56, 16 }
  0x6d   : > { %1993 = vmatmul.msk.bf16.vlgmr.msra.gmra.mxu3 %vm277_vm0, %v1964_v14  ;;  %2037 = vmatmul.msk.bf16.vlgmr.msra.gmra.mxu0 %vm277_vm0, %v1440_v15  ;;  %v935_v14 = vrot.slane %v933_v4, 5  ;;  %v945_v15 = vrot.slane %v944_v5, 4  ;;  %v1416_v4 = vor.u32 %v1415_v55, %v1412_v54  ;;  %v1419_v5 = vshll.u32 %v2012_v57, 16 }
  0x6f   : > { %v936_v25 = vsel %vm2231_vm3, %v931_v13, %v935_v14  ;;  %v950_v26 = vsel %vm2231_vm3, %v945_v15, %v949_v16  ;;  %v1421_v13 = vrot.slane %v1419_v5, 5 }
  0x70   : > { %v992_v38 = vunpack.c.l.b16 %v936_v25  ;;  %v993_v39 = vunpack.c.l.b16 %v950_v26  ;;  %v2095_v25 = vld [vmem:[%s2183_s26 + $0x84] sm:$0xf0] }
  0x71   : > { %v1976_v29 = vor.u32 %v2095_v25, %v1975_v24 }
  0x72   : > { %v998_v58 = vpack.c.b16 %v993_v39, %v992_v38 }
  0x7b   : > { %1890 = vmatmul.msk.bf16.gmra.mxu1 %vm277_vm0, %v997_v63  ;;  %1942 = vmatmul.msk.bf16.gmra.mxu2 %vm277_vm0, %v1916_v0  ;;  %v961_v63 = vshll.u32 %v1862_v46, 16  ;;  %v972_v0 = vor.u32 %v971_v50, %v968_v49 }
  0x7d   : > { %1994 = vmatmul.msk.bf16.gmra.mxu3 %vm277_vm0, %v1968_v11  ;;  %2038 = vmatmul.msk.bf16.gmra.mxu0 %vm277_vm0, %v1441_v12  ;;  %v963_v7 = vrot.slane %v961_v63, 5  ;;  %v973_v8 = vrot.slane %v972_v0, 4  ;;  %v1407_v11 = vrot.slane %v1405_v3, 5  ;;  %v1417_v12 = vrot.slane %v1416_v4, 4 }
  0x7f   : > { %v964_v14 = vsel %vm2231_vm3, %v959_v6, %v963_v7  ;;  %v978_v15 = vsel %vm2231_vm3, %v973_v8, %v977_v9  ;;  %v1408_v16 = vsel %vm2231_vm3, %v1403_v10, %v1407_v11  ;;  %v1422_v17 = vsel %vm2231_vm3, %v1417_v12, %v1421_v13 }
  0x80   : > { %v994_v18 = vunpack.c.l.b16 %v964_v14  ;;  %v995_v19 = vunpack.c.l.b16 %v978_v15  ;;  %v1438_v22 = vunpack.c.l.b16 %v1408_v16  ;;  %v1439_v23 = vunpack.c.l.b16 %v1422_v17 }
  0x82   : > { %v999_v26 = vpack.c.b16 %v995_v19, %v994_v18  ;;  %v1443_v30 = vpack.c.b16 %v1439_v23, %v1438_v22  ;;  %v2519_v22 = vld [vmem:[%s2592_s2] ss:$0 sm:$0xff] }
  0x8b   : > { %1891 = vmatmul.msk.bf16.gmra.mxu1 %vm277_vm0, %v998_v58  ;;  %1943 = vmatmul.msk.bf16.gmra.mxu2 %vm277_vm0, %v1920_v59 }
  0x8d   : > { %1995 = vmatmul.msk.bf16.gmra.mxu3 %vm277_vm0, %v1972_v60  ;;  %2039 = vmatmul.msk.bf16.gmra.mxu0 %vm277_vm0, %v1442_v61 }
  0x98   : > { %v304_v28 = vpop.f32.mrf.mxu1 }
  0x9a   : > { %v299_v31 = vpop.f32.mrf.mxu0 }
  0x9b   : > { %1892 = vmatmul.msk.bf16.gmra.mxu1 %vm277_vm0, %v999_v26  ;;  %1944 = vmatmul.msk.bf16.gmra.mxu2 %vm277_vm0, %v1924_v27  ;;  %v2524_v26 = vld [vmem:[%s2593_s3] ss:$0 sm:$0xff] }
  0x9d   : > { %1996 = vmatmul.msk.bf16.gmra.mxu3 %vm277_vm0, %v1976_v29  ;;  %2040 = vmatmul.msk.bf16.gmra.mxu0 %vm277_vm0, %v1443_v30 }
  0x9e   : > { %v2470_v45 = vpop.f32.mrf.mxu2 }
  0xa0   : > { %v2472_v32 = vpop.f32.mrf.mxu3  ;;  %v2474_v33 = vpop.f32.mrf.mxu1 }
  0xa2   : > { %v301_v34 = vpop.f32.mrf.mxu0 }
  0xa6   : > { %v2476_v35 = vpop.f32.mrf.mxu2 }
  0xa8   : > { %v2478_v36 = vpop.f32.mrf.mxu3  ;;  %v384_v37 = vpop.f32.mrf.mxu1 }
  0xa9   : > { %v385_v3 = vadd.f32 %v384_v37, %v299_v31 }
  0xaa   : > { %v823_v38 = vpop.f32.mrf.mxu0 }
  0xae   : > { %v601_v39 = vpop.f32.mrf.mxu2 }
  0xaf   : > { %v621_v5 = vadd.f32 %v601_v39, %v385_v3 }
  0xb0   : > { %v712_v40 = vpop.f32.mrf.mxu3  ;;  %v386_v41 = vpop.f32.mrf.mxu1 }
  0xb1   : > { %v732_v7 = vadd.f32 %v712_v40, %v621_v5  ;;  %v387_v10 = vadd.f32 %v386_v41, %v301_v34 }
  0xb2   : > { %v825_v42 = vpop.f32.mrf.mxu0 }
  0xb3   : > { %v843_v13 = vadd.f32 %v823_v38, %v732_v7 }
  0xb6   : > { %v603_v43 = vpop.f32.mrf.mxu2 }
  0xb7   : > { %v622_v12 = vadd.f32 %v603_v43, %v387_v10 }
  0xb8   : > { %v714_v44 = vpop.f32.mrf.mxu3  ;;  %v389_v46 = vpop.f32.mrf.mxu1 }
  0xb9   : > { %v733_v16 = vadd.f32 %v714_v44, %v622_v12  ;;  %v390_v20 = vadd.f32 %v389_v46, %v304_v28 }
  0xba   : > { %v2480_v47 = vpop.f32.mrf.mxu0 }
  0xbb   : > { %v844_v27 = vadd.f32 %v825_v42, %v733_v16 }
  0xbe   : > { %v606_v48 = vpop.f32.mrf.mxu2 }
  0xbf   : > { %v623_v24 = vadd.f32 %v606_v48, %v390_v20 }
  0xc0   : > { %v717_v49 = vpop.f32.mrf.mxu3  ;;  %v391_v50 = vpop.f32.mrf.mxu1 }
  0xc1   : > { %v734_v28 = vadd.f32 %v717_v49, %v623_v24  ;;  %v392_v40 = vadd.f32 %v391_v50, %v2474_v33 }
  0xc2   : > { %v2482_v51 = vpop.f32.mrf.mxu0 }
  0xc3   : > { %v845_v49 = vadd.f32 %v2480_v47, %v734_v28 }
  0xc6   : > { %v608_v52 = vpop.f32.mrf.mxu2 }
  0xc7   : > { %v624_v42 = vadd.f32 %v608_v52, %v392_v40 }
  0xc8   : > { %v719_v53 = vpop.f32.mrf.mxu3  ;;  %v2484_v54 = vpop.f32.mrf.mxu1 }
  0xc9   : > { %v735_v5 = vadd.f32 %v719_v53, %v624_v42  ;;  %v395_v52 = vadd.f32 %v2484_v54, %v2470_v45 }
  0xca   : > { %v2486_v55 = vpop.f32.mrf.mxu0 }
  0xce   : > { %v2488_v56 = vpop.f32.mrf.mxu2 }
  0xcf   : > { %v625_v47 = vadd.f32 %v2488_v56, %v395_v52 }
  0xd0   : > { %v2490_v57 = vpop.f32.mrf.mxu3  ;;  %v2492_v58 = vpop.f32.mrf.mxu1 }
  0xd1   : > { %v736_v20 = vadd.f32 %v2490_v57, %v625_v47  ;;  %v397_v56 = vadd.f32 %v2492_v58, %v2476_v35 }
  0xd2   : > { %v2494_v59 = vpop.f32.mrf.mxu0 }
  0xd6   : > { %v2496_v60 = vpop.f32.mrf.mxu2 }
  0xd8   : > { %v2498_v61 = vpop.f32.mrf.mxu3  ;;  %v2500_v62 = vpop.f32.mrf.mxu1 }
  0xda   : > { %v2502_v63 = vpop.f32.mrf.mxu0 }
  0xde   : > { %v2504_v0 = vpop.f32.mrf.mxu2 }
  0xe0   : > { %v2506_v1 = vpop.f32.mrf.mxu3  ;;  %v2508_v2 = vpop.f32.mrf.mxu1 }
  0xe2   : > { %v2510_v4 = vpop.f32.mrf.mxu0 }
  0xe6   : > { %v2512_v6 = vpop.f32.mrf.mxu2 }
  0xe8   : > { %v2514_v8 = vpop.f32.mrf.mxu3  ;;  %v1045_v9 = vpop.f32.mrf.mxu1 }
  0xe9   : > { %v1065_v14 = vadd.f32 %v1045_v9, %v843_v13 }
  0xea   : > { %v1489_v11 = vpop.f32.mrf.mxu0 }
  0xee   : > { %v1156_v15 = vpop.f32.mrf.mxu2 }
  0xef   : > { %v1176_v17 = vadd.f32 %v1156_v15, %v1065_v14 }
  0xf0   : > { %v1267_v18 = vpop.f32.mrf.mxu3  ;;  %v1047_v19 = vpop.f32.mrf.mxu1 }
  0xf1   : > { %v1287_v21 = vadd.f32 %v1267_v18, %v1176_v17  ;;  %v1066_v30 = vadd.f32 %v1047_v19, %v844_v27  ;;  %v846_v17 = vadd.f32 %v2482_v51, %v735_v5  ;;  %v626_v51 = vadd.f32 %v2496_v60, %v397_v56 }
  0xf2   : > { %v1491_v23 = vpop.f32.mrf.mxu0  ;;  %v400_v60 = vadd.f32 %v2500_v62, %v2472_v32 }
  0xf3   : > { %v1509_v25 = vadd.f32 %v1489_v11, %v1287_v21 }
  0xf5   : > { %v1521_v29 = vmul.f32 %v2519_v22, %v1509_v25 }
  0xf6   : > { %v1158_v31 = vpop.f32.mrf.mxu2 }
  0xf7   : > { %v1533_v34 = vadd.f32 %v2524_v26, %v1521_v29  ;;  %v1177_v37 = vadd.f32 %v1158_v31, %v1066_v30  ;;  %v847_v30 = vadd.f32 %v2486_v55, %v736_v20 }
  0xf8   : > { %v1269_v38 = vpop.f32.mrf.mxu3  ;;  %v1050_v39 = vpop.f32.mrf.mxu1 }
  0xf9   : > { %v1541_v41 = vmax.f32 %v1533_v34, 0.0  ;;  %v1288_v43 = vadd.f32 %v1269_v38, %v1177_v37  ;;  %v1067_v33 = vadd.f32 %v1050_v39, %v845_v49  ;;  %v737_v37 = vadd.f32 %v2498_v61, %v626_v51 }
  0xfa   : > { %v1494_v44 = vpop.f32.mrf.mxu0 }
  0xfb   : > { %v1549_v46 = vpack.c.bf16 %v1541_v41, %v1541_v41  ;;  %v1510_v48 = vadd.f32 %v1491_v23, %v1288_v43  ;;  %v627_v41 = vadd.f32 %v2504_v0, %v400_v60  ;;  %v848_v42 = vadd.f32 %v2494_v59, %v737_v37 }
  0xfc   : > { %v402_v0 = vadd.f32 %v2508_v2, %v2478_v36 }
  0xfd   : > { %1558 = vst.msk [vmem:[%s2533_s30] sm:$0xf] %vm1557_vm4, %v1549_v46  ;;  %v1522_v3 = vmul.f32 %v2519_v22, %v1510_v48 }
  0xfe   : > { %v1161_v50 = vpop.f32.mrf.mxu2 }
  0xff   : > { %v1534_v7 = vadd.f32 %v2524_v26, %v1522_v3  ;;  %v1178_v9 = vadd.f32 %v1161_v50, %v1067_v33  ;;  %v738_v3 = vadd.f32 %v2506_v1, %v627_v41 }
 0x100   : > { %v1272_v10 = vpop.f32.mrf.mxu3  ;;  %v1052_v11 = vpop.f32.mrf.mxu1 }
 0x101   : > { %v1542_v12 = vmax.f32 %v1534_v7, 0.0  ;;  %v1289_v13 = vadd.f32 %v1272_v10, %v1178_v9  ;;  %v1068_v18 = vadd.f32 %v1052_v11, %v846_v17  ;;  %v628_v7 = vadd.f32 %v2512_v6, %v402_v0 }
 0x102   : > { %v1496_v14 = vpop.f32.mrf.mxu0  ;;  %v849_v11 = vadd.f32 %v2502_v63, %v738_v3 }
 0x103   : > { %v1550_v15 = vpack.c.bf16 %v1542_v12, %v1542_v12  ;;  %v1511_v16 = vadd.f32 %v1494_v44, %v1289_v13  ;;  %v739_v13 = vadd.f32 %v2514_v8, %v628_v7 }
 0x105   : > { %1559 = vst.msk [vmem:[%s2533_s30 + $0x4] sm:$0xf] %vm1557_vm4, %v1550_v15  ;;  %v1523_v53 = vmul.f32 %v2519_v22, %v1511_v16 }
 0x106   : > { %v1163_v19 = vpop.f32.mrf.mxu2 }
 0x107   : > { %v1535_v45 = vadd.f32 %v2524_v26, %v1523_v53  ;;  %v1179_v54 = vadd.f32 %v1163_v19, %v1068_v18  ;;  %v850_v53 = vadd.f32 %v2510_v4, %v739_v13 }
 0x108   : > { %v1274_v21 = vpop.f32.mrf.mxu3  ;;  %v1055_v23 = vpop.f32.mrf.mxu1 }
 0x109   : > { %v1543_v24 = vmax.f32 %v1535_v45, 0.0  ;;  %v1290_v25 = vadd.f32 %v1274_v21, %v1179_v54  ;;  %v1069_v28 = vadd.f32 %v1055_v23, %v847_v30 }
 0x10a   : > { %v1499_v31 = vpop.f32.mrf.mxu0 }
 0x10b   : > { %v1551_v27 = vpack.c.bf16 %v1543_v24, %v1543_v24  ;;  %v1512_v29 = vadd.f32 %v1496_v14, %v1290_v25 }
 0x10d   : > { %1560 = vst.msk [vmem:[%s2533_s30 + $0x8] sm:$0xf] %vm1557_vm4, %v1551_v27  ;;  %v1524_v57 = vmul.f32 %v2519_v22, %v1512_v29 }
 0x10e   : > { %v1166_v34 = vpop.f32.mrf.mxu2 }
 0x10f   : > { %v1536_v35 = vadd.f32 %v2524_v26, %v1524_v57  ;;  %v1180_v58 = vadd.f32 %v1166_v34, %v1069_v28 }
 0x110   : > { %v1277_v38 = vpop.f32.mrf.mxu3  ;;  %v1057_v39 = vpop.f32.mrf.mxu1 }
 0x111   : > { %v1544_v40 = vmax.f32 %v1536_v35, 0.0  ;;  %v1291_v55 = vadd.f32 %v1277_v38, %v1180_v58  ;;  %v1070_v46 = vadd.f32 %v1057_v39, %v848_v42 }
 0x112   : > { %v1501_v48 = vpop.f32.mrf.mxu0 }
 0x113   : > { %v1552_v43 = vpack.c.bf16 %v1544_v40, %v1544_v40  ;;  %v1513_v44 = vadd.f32 %v1499_v31, %v1291_v55 }
 0x115   : > { %1561 = vst.msk [vmem:[%s2533_s30 + $0xc] sm:$0xf] %vm1557_vm4, %v1552_v43  ;;  %v1525_v61 = vmul.f32 %v2519_v22, %v1513_v44 }
 0x116   : > { %v1168_v49 = vpop.f32.mrf.mxu2 }
 0x117   : > { %v1537_v32 = vadd.f32 %v2524_v26, %v1525_v61  ;;  %v1181_v62 = vadd.f32 %v1168_v49, %v1070_v46 }
 0x118   : > { %v1279_v33 = vpop.f32.mrf.mxu3  ;;  %v1060_v50 = vpop.f32.mrf.mxu1 }
 0x119   : > { %v1545_v5 = vmax.f32 %v1537_v32, 0.0  ;;  %v1292_v59 = vadd.f32 %v1279_v33, %v1181_v62  ;;  %v1071_v52 = vadd.f32 %v1060_v50, %v849_v11 }
 0x11a   : > { %v1504_v47 = vpop.f32.mrf.mxu0 }
 0x11b   : > { %v1553_v9 = vpack.c.bf16 %v1545_v5, %v1545_v5  ;;  %v1514_v10 = vadd.f32 %v1501_v48, %v1292_v59 }
 0x11d   : > { %1562 = vst.msk [vmem:[%s2533_s30 + $0x10] sm:$0xf] %vm1557_vm4, %v1553_v9  ;;  %v1526_v1 = vmul.f32 %v2519_v22, %v1514_v10 }
 0x11e   : > { %v1171_v12 = vpop.f32.mrf.mxu2 }
 0x11f   : > { %v1538_v14 = vadd.f32 %v2524_v26, %v1526_v1  ;;  %v1182_v36 = vadd.f32 %v1171_v12, %v1071_v52 }
 0x120   : > { %v1282_v2 = vpop.f32.mrf.mxu3  ;;  %v1062_v16 = vpop.f32.mrf.mxu1 }
 0x121   : > { %v1546_v15 = vmax.f32 %v1538_v14, 0.0  ;;  %v1293_v6 = vadd.f32 %v1282_v2, %v1182_v36  ;;  %v1072_v19 = vadd.f32 %v1062_v16, %v850_v53 }
 0x122   : > { %v1506_v56 = vpop.f32.mrf.mxu0 }
 0x123   : > { %v1554_v17 = vpack.c.bf16 %v1546_v15, %v1546_v15  ;;  %v1515_v63 = vadd.f32 %v1504_v47, %v1293_v6 }
 0x125   : > { %1563 = vst.msk [vmem:[%s2533_s30 + $0x14] sm:$0xf] %vm1557_vm4, %v1554_v17  ;;  %v1527_v18 = vmul.f32 %v2519_v22, %v1515_v63 }
 0x126   : > { %v1173_v8 = vpop.f32.mrf.mxu2 }
 0x127   : > { %v1539_v20 = vadd.f32 %v2524_v26, %v1527_v18  ;;  %v1183_v45 = vadd.f32 %v1173_v8, %v1072_v19 }
 0x128   : > { %v1284_v54 = vpop.f32.mrf.mxu3 }
 0x129   : > { %v1547_v21 = vmax.f32 %v1539_v20, 0.0  ;;  %v1294_v23 = vadd.f32 %v1284_v54, %v1183_v45 }
 0x12b   : > { %v1555_v24 = vpack.c.bf16 %v1547_v21, %v1547_v21  ;;  %v1516_v25 = vadd.f32 %v1506_v56, %v1294_v23 }
 0x12d   : > { %1564 = vst.msk [vmem:[%s2533_s30 + $0x18] sm:$0xf] %vm1557_vm4, %v1555_v24  ;;  %v1528_v4 = vmul.f32 %v2519_v22, %v1516_v25 }
 0x12f   : > { %v1540_v51 = vadd.f32 %v2524_v26, %v1528_v4 }
 0x131   : > { %v1548_v27 = vmax.f32 %v1540_v51, 0.0 }
 0x133   : > { %v1556_v29 = vpack.c.bf16 %v1548_v27, %v1548_v27 }
 0x135   : > { %1565 = vst.msk [vmem:[%s2533_s30 + $0x1c] sm:$0xf] %vm1557_vm4, %v1556_v29 }
 0x136 PF: > { %s14_s15 = sadd.s32 1, %s2133_s15  }
 0x137   : > { %p11_p4 = scmp.ge.s32.totalorder %s14_s15, 4  }
 0x139   :  { %13 = sbr.rel (!%p11_p4) target bundleno = 1 (0x1), region = 79 }

// kernel: encoder_bottleneck_forward.7
= control target key start
LH: loop header
LB: loop body
LE: loop exit
PB: predicated region body
PF: predicated region fallthrough
CT: control target
= control target key end

     0   :  { %s747_s0 = inlined_call_operand.vmem [shape: bf16[128,128], index: 0, kind: input, shape index: {}]   ;;  %s748_s1 = inlined_call_operand.vmem [shape: bf16[128,128], index: 1, kind: input, shape index: {}]   ;;  %s749_s2 = inlined_call_operand.vmem [shape: f32[1,128], index: 2, kind: input, shape index: {}]   ;;  %s750_s3 = inlined_call_operand.vmem [shape: f32[1,128], index: 3, kind: input, shape index: {}]   ;;  %s751_s4 = inlined_call_operand.vmem [shape: bf16[128,128], index: 4, kind: input, shape index: {}]   ;;  %s752_s5 = inlined_call_operand.hbm [shape: f32[128,128], index: 5, kind: output, shape index: {}]  }
   0x1   :  { %v502_v0 = vld [vmem:[%s748_s1 + $0x38] sm:$0xff]  ;;  %v501_v1 = vld [vmem:[%s748_s1 + $0x30] sm:$0xff] }
   0x2   :  { %185 = vmatpush.bf16.msra.mxu0 %v502_v0  ;;  %542 = vmatpush.bf16.msra.mxu1 %v502_v0 }
   0x3   :  { %543 = vmatpush.bf16.msra.mxu2 %v502_v0  ;;  %544 = vmatpush.bf16.msra.mxu3 %v502_v0 }
   0x4   :  { %10 = vsyncpa [#allocation4], 0  ;;  %v500_v2 = vld [vmem:[%s748_s1 + $0x28] sm:$0xff]  ;;  %v499_v3 = vld [vmem:[%s748_s1 + $0x20] sm:$0xff]  ;;  %s411_s18 = sshll.u32 %s752_s5, 4  ;;  %s598_s19 = smov 128   ;;  %s412_s18 = int_to_ptr.hbm [resolvable:$true] %s411_s18 }
   0x5   :  { %v498_v4 = vld [vmem:[%s748_s1 + $0x18] sm:$0xff]  ;;  %v497_v5 = vld [vmem:[%s748_s1 + $0x10] sm:$0xff]  ;;  %v496_v6 = vld [vmem:[%s748_s1 + $0x8] sm:$0xff]  ;;  %s599_s20 = smov 8  }
   0x6   :  { %186 = vmatpush.bf16.msra.mxu0 %v501_v1  ;;  %545 = vmatpush.bf16.msra.mxu1 %v501_v1  ;;  %v495_v7 = vld [vmem:[%s748_s1] sm:$0xff]  ;;  %v489_v9 = vld [vmem:[%s747_s0 + $0x10] sm:$0xff]  ;;  %v488_v12 = vld [vmem:[%s747_s0 + $0x8] sm:$0xff] }
   0x7   :  { %546 = vmatpush.bf16.msra.mxu2 %v501_v1  ;;  %547 = vmatpush.bf16.msra.mxu3 %v501_v1  ;;  %v487_v8 = vld [vmem:[%s747_s0] sm:$0xff]  ;;  %v493_v11 = vld [vmem:[%s747_s0 + $0x30] sm:$0xff]  ;;  %v490_v13 = vld [vmem:[%s747_s0 + $0x18] sm:$0xff] }
   0x8   :  { %v491_v10 = vld [vmem:[%s747_s0 + $0x20] sm:$0xff]  ;;  %v492_v14 = vld [vmem:[%s747_s0 + $0x28] sm:$0xff]  ;;  %v494_v15 = vld [vmem:[%s747_s0 + $0x38] sm:$0xff] }
   0x9   :  { %v681_v16 = vld [vmem:[%s749_s2] ss:$0 sm:$0xff]  ;;  %v536_v18 = vld [vmem:[%s751_s4 + $0x10] sm:$0xff]   ;;  %v535_v56 = vld [vmem:[%s751_s4 + $0x8] sm:$0xff]  }
   0xa   :  { %187 = vmatpush.bf16.msra.mxu0 %v500_v2  ;;  %548 = vmatpush.bf16.msra.mxu1 %v500_v2  ;;  %v504_v17 = vld [vmem:[%s751_s4] sm:$0xff]   ;;  %v513_v25 = vunpack.c.l.bf16 %v536_v18  ;;  %v540_v31 = vld [vmem:[%s751_s4 + $0x30] sm:$0xff]   ;;  %v514_v45 = vunpack.c.h.bf16 %v536_v18  ;;  %v537_v57 = vld [vmem:[%s751_s4 + $0x18] sm:$0xff]  }
   0xb   :  { %549 = vmatpush.bf16.msra.mxu2 %v500_v2  ;;  %550 = vmatpush.bf16.msra.mxu3 %v500_v2  ;;  %v692_v19 = vld [vmem:[%s750_s3] ss:$0 sm:$0xff]  ;;  %v505_v23 = vunpack.c.l.bf16 %v504_v17  ;;  %v529_v39 = vunpack.c.l.bf16 %v540_v31  ;;  %v506_v43 = vunpack.c.h.bf16 %v504_v17  ;;  %v530_v1 = vunpack.c.h.bf16 %v540_v31  ;;  %v539_v17 = vld [vmem:[%s751_s4 + $0x28] sm:$0xff]   ;;  %v541_v18 = vld [vmem:[%s751_s4 + $0x38] sm:$0xff]  }
   0xc   :  { %v538_v30 = vld [vmem:[%s751_s4 + $0x20] sm:$0xff]   ;;  %s597_s4 = smov [#allocation3]  }
   0xd   :  { %v521_v37 = vunpack.c.l.bf16 %v538_v30  ;;  %v522_v63 = vunpack.c.h.bf16 %v538_v30  ;;  %s409_s16 = sshll.u32 %s597_s4, 4  ;;  %s410_s16 = int_to_ptr.vmem [resolvable:$true] %s409_s16 }
   0xe   :  { %188 = vmatpush.bf16.msra.mxu0 %v499_v3  ;;  %551 = vmatpush.bf16.msra.mxu1 %v499_v3 }
   0xf   :  { %552 = vmatpush.bf16.msra.mxu2 %v499_v3  ;;  %553 = vmatpush.bf16.msra.mxu3 %v499_v3 }
  0x12   :  { %189 = vmatpush.bf16.msra.mxu0 %v498_v4  ;;  %554 = vmatpush.bf16.msra.mxu1 %v498_v4 }
  0x13   :  { %555 = vmatpush.bf16.msra.mxu2 %v498_v4  ;;  %556 = vmatpush.bf16.msra.mxu3 %v498_v4 }
  0x16   :  { %190 = vmatpush.bf16.msra.mxu0 %v497_v5  ;;  %557 = vmatpush.bf16.msra.mxu1 %v497_v5 }
  0x17   :  { %558 = vmatpush.bf16.msra.mxu2 %v497_v5  ;;  %559 = vmatpush.bf16.msra.mxu3 %v497_v5  ;;  %v509_v5 = vunpack.c.l.bf16 %v535_v56 }
  0x1a   :  { %191 = vmatpush.bf16.msra.mxu0 %v496_v6  ;;  %560 = vmatpush.bf16.msra.mxu1 %v496_v6 }
  0x1b   :  { %561 = vmatpush.bf16.msra.mxu2 %v496_v6  ;;  %562 = vmatpush.bf16.msra.mxu3 %v496_v6 }
  0x1e   :  { %192 = vmatpush.bf16.msra.mxu0 %v495_v7  ;;  %563 = vmatpush.bf16.msra.mxu1 %v495_v7 }
  0x1f   :  { %564 = vmatpush.bf16.msra.mxu2 %v495_v7  ;;  %565 = vmatpush.bf16.msra.mxu3 %v495_v7  ;;  %v517_v7 = vunpack.c.l.bf16 %v537_v57 }
  0x21   :  { %193 = vmatmul.bf16.vlgmr.msra.gmra.mxu0 %v487_v8  ;;  %203 = vmatmul.bf16.vlgmr.msra.gmra.mxu1 %v489_v9 }
  0x22   :  { %213 = vmatmul.bf16.vlgmr.msra.gmra.mxu2 %v491_v10  ;;  %223 = vmatmul.bf16.vlgmr.msra.gmra.mxu3 %v493_v11 }
  0x31   :  { %198 = vmatmul.bf16.gmra.mxu0 %v488_v12  ;;  %208 = vmatmul.bf16.gmra.mxu1 %v490_v13 }
  0x32   :  { %218 = vmatmul.bf16.gmra.mxu2 %v492_v14  ;;  %228 = vmatmul.bf16.gmra.mxu3 %v494_v15 }
  0x9e   :  { %v194_v20 = vpop.f32.mrf.mxu0  ;;  %v204_v21 = vpop.f32.mrf.mxu1 }
  0x9f   :  { %v289_v22 = vmul.f32 %v681_v16, %v194_v20  ;;  %v293_v24 = vmul.f32 %v681_v16, %v204_v21 }
  0xa1   :  { %v309_v26 = vadd.f32 %v692_v19, %v289_v22  ;;  %v313_v27 = vadd.f32 %v692_v19, %v293_v24 }
  0xa3   :  { %v357_v28 = vadd.f32 %v505_v23, %v309_v26  ;;  %v361_v29 = vadd.f32 %v513_v25, %v313_v27  ;;  %v525_v27 = vunpack.c.l.bf16 %v539_v17 }
  0xa5   :  { %v373_v32 = vmax.f32 %v357_v28, 0.0  ;;  %v377_v33 = vmax.f32 %v361_v29, 0.0  ;;  %v214_v34 = vpop.f32.mrf.mxu2  ;;  %v224_v35 = vpop.f32.mrf.mxu3  ;;  %v533_v29 = vunpack.c.l.bf16 %v541_v18 }
  0xa6   :  { %v297_v36 = vmul.f32 %v681_v16, %v214_v34  ;;  %v301_v38 = vmul.f32 %v681_v16, %v224_v35  ;;  %v196_v40 = vpop.f32.mrf.mxu0  ;;  %v206_v41 = vpop.f32.mrf.mxu1  ;;  %v518_v35 = vunpack.c.h.bf16 %v537_v57 }
  0xa7   :  { %389 = vst [vmem:[#allocation3] sm:$0xff] %v373_v32  ;;  %v290_v42 = vmul.f32 %v681_v16, %v196_v40  ;;  %v294_v44 = vmul.f32 %v681_v16, %v206_v41 }
  0xa8   :  { %393 = vst [vmem:[#allocation3 + $0x20] sm:$0xff] %v377_v33  ;;  %v317_v46 = vadd.f32 %v692_v19, %v297_v36  ;;  %v321_v47 = vadd.f32 %v692_v19, %v301_v38  ;;  %v510_v33 = vunpack.c.h.bf16 %v535_v56 }
  0xa9   :  { %v310_v48 = vadd.f32 %v692_v19, %v290_v42  ;;  %v314_v49 = vadd.f32 %v692_v19, %v294_v44 }
  0xaa   :  { %v365_v50 = vadd.f32 %v521_v37, %v317_v46  ;;  %v369_v51 = vadd.f32 %v529_v39, %v321_v47 }
  0xab   :  { %v358_v52 = vadd.f32 %v506_v43, %v310_v48  ;;  %v362_v53 = vadd.f32 %v514_v45, %v314_v49 }
  0xac   :  { %v381_v54 = vmax.f32 %v365_v50, 0.0  ;;  %v385_v55 = vmax.f32 %v369_v51, 0.0  ;;  %v526_v51 = vunpack.c.h.bf16 %v539_v17 }
  0xad   :  { %v374_v58 = vmax.f32 %v358_v52, 0.0  ;;  %v378_v59 = vmax.f32 %v362_v53, 0.0  ;;  %v216_v60 = vpop.f32.mrf.mxu2  ;;  %v226_v61 = vpop.f32.mrf.mxu3  ;;  %v534_v53 = vunpack.c.h.bf16 %v541_v18 }
  0xae   :  { %397 = vst [vmem:[#allocation3 + $0x40] sm:$0xff] %v381_v54  ;;  %v298_v62 = vmul.f32 %v681_v16, %v216_v60  ;;  %v302_v0 = vmul.f32 %v681_v16, %v226_v61  ;;  %v199_v2 = vpop.f32.mrf.mxu0  ;;  %v209_v3 = vpop.f32.mrf.mxu1 }
  0xaf   :  { %401 = vst [vmem:[#allocation3 + $0x60] sm:$0xff] %v385_v55  ;;  %v291_v4 = vmul.f32 %v681_v16, %v199_v2  ;;  %v295_v6 = vmul.f32 %v681_v16, %v209_v3 }
  0xb0   :  { %390 = vst [vmem:[#allocation3 + $0x8] sm:$0xff] %v374_v58  ;;  %v318_v8 = vadd.f32 %v692_v19, %v298_v62  ;;  %v322_v9 = vadd.f32 %v692_v19, %v302_v0 }
  0xb1   :  { %394 = vst [vmem:[#allocation3 + $0x28] sm:$0xff] %v378_v59  ;;  %v311_v10 = vadd.f32 %v692_v19, %v291_v4  ;;  %v315_v11 = vadd.f32 %v692_v19, %v295_v6 }
  0xb2   :  { %v366_v12 = vadd.f32 %v522_v63, %v318_v8  ;;  %v370_v13 = vadd.f32 %v530_v1, %v322_v9 }
  0xb3   :  { %v359_v14 = vadd.f32 %v509_v5, %v311_v10  ;;  %v363_v15 = vadd.f32 %v517_v7, %v315_v11 }
  0xb4   :  { %v382_v20 = vmax.f32 %v366_v12, 0.0  ;;  %v386_v21 = vmax.f32 %v370_v13, 0.0 }
  0xb5   :  { %v375_v22 = vmax.f32 %v359_v14, 0.0  ;;  %v379_v23 = vmax.f32 %v363_v15, 0.0  ;;  %v219_v24 = vpop.f32.mrf.mxu2  ;;  %v229_v25 = vpop.f32.mrf.mxu3 }
  0xb6   :  { %398 = vst [vmem:[#allocation3 + $0x48] sm:$0xff] %v382_v20  ;;  %v299_v26 = vmul.f32 %v681_v16, %v219_v24  ;;  %v303_v28 = vmul.f32 %v681_v16, %v229_v25  ;;  %v201_v30 = vpop.f32.mrf.mxu0  ;;  %v211_v31 = vpop.f32.mrf.mxu1 }
  0xb7   :  { %402 = vst [vmem:[#allocation3 + $0x68] sm:$0xff] %v386_v21  ;;  %v292_v32 = vmul.f32 %v681_v16, %v201_v30  ;;  %v296_v34 = vmul.f32 %v681_v16, %v211_v31 }
  0xb8   :  { %391 = vst [vmem:[#allocation3 + $0x10] sm:$0xff] %v375_v22  ;;  %v319_v36 = vadd.f32 %v692_v19, %v299_v26  ;;  %v323_v37 = vadd.f32 %v692_v19, %v303_v28 }
  0xb9   :  { %395 = vst [vmem:[#allocation3 + $0x30] sm:$0xff] %v379_v23  ;;  %v312_v38 = vadd.f32 %v692_v19, %v292_v32  ;;  %v316_v39 = vadd.f32 %v692_v19, %v296_v34 }
  0xba   :  { %v367_v40 = vadd.f32 %v525_v27, %v319_v36  ;;  %v371_v41 = vadd.f32 %v533_v29, %v323_v37 }
  0xbb   :  { %v360_v42 = vadd.f32 %v510_v33, %v312_v38  ;;  %v364_v43 = vadd.f32 %v518_v35, %v316_v39 }
  0xbc   :  { %v383_v44 = vmax.f32 %v367_v40, 0.0  ;;  %v387_v45 = vmax.f32 %v371_v41, 0.0 }
  0xbd   :  { %v376_v46 = vmax.f32 %v360_v42, 0.0  ;;  %v380_v47 = vmax.f32 %v364_v43, 0.0  ;;  %v221_v48 = vpop.f32.mrf.mxu2  ;;  %v231_v49 = vpop.f32.mrf.mxu3 }
  0xbe   :  { %399 = vst [vmem:[#allocation3 + $0x50] sm:$0xff] %v383_v44  ;;  %v300_v50 = vmul.f32 %v681_v16, %v221_v48  ;;  %v304_v52 = vmul.f32 %v681_v16, %v231_v49 }
  0xbf   :  { %403 = vst [vmem:[#allocation3 + $0x70] sm:$0xff] %v387_v45 }
  0xc0   :  { %392 = vst [vmem:[#allocation3 + $0x18] sm:$0xff] %v376_v46  ;;  %v320_v54 = vadd.f32 %v692_v19, %v300_v50  ;;  %v324_v55 = vadd.f32 %v692_v19, %v304_v52 }
  0xc1   :  { %396 = vst [vmem:[#allocation3 + $0x38] sm:$0xff] %v380_v47 }
  0xc2   :  { %v368_v56 = vadd.f32 %v526_v51, %v320_v54  ;;  %v372_v57 = vadd.f32 %v534_v53, %v324_v55 }
  0xc4   :  { %v384_v58 = vmax.f32 %v368_v56, 0.0  ;;  %v388_v59 = vmax.f32 %v372_v57, 0.0 }
  0xc6   :  { %400 = vst [vmem:[#allocation3 + $0x58] sm:$0xff] %v384_v58 }
  0xc7   :  { %404 = vst [vmem:[#allocation3 + $0x78] sm:$0xff] %v388_v59 }
  0xc8   :  { %417 = dma.vmem_to_hbm [thread:$0]  %s410_s16, 2048, %s412_s18, [#allocation4], %s598_s19, %s598_s19, %s599_s20  }
  0xc9   :  { %595 = dma.done.wait [#allocation4], 2048  }
  0xca   :  { %596 = vsyncadd [#allocation4], 4294965248 }
  0xcb   :  { %422 = vsyncpa [#allocation4], 1 }

</bundles_post_ra>
